<compile_context>
chip_gen: v5e
topology: v5e:2x2
jax: 0.10.0
libtpu: 0.0.40
codegen_flags: <defaults>
</compile_context>

<pallas_src>
import jax
import jax.numpy as jnp
from jax.experimental import pallas as pl
from jax.experimental.pallas import tpu as pltpu


def upsample_block_kernel(x_ref, w_ref, b_ref, alpha_ref, o_ref, lhs_ref):
    # x_ref:     (TH+2, W+2, Cin)   bf16 zero-padded input rows for this tile
    # w_ref:     (9*Cin, Cout)      bf16 im2col weights, out channels ordered (i, j, c)
    # b_ref:     (1, Cout)          f32 bias (same channel order)
    # alpha_ref: (1,)               f32 PReLU slope (SMEM scalar)
    # o_ref:     (TH, r, W, r*C)    fused conv + PixelShuffle + PReLU output (bf16)
    # lhs_ref:   (TH*W, 9*Cin)      bf16 im2col scratch (VMEM)
    cin = x_ref.shape[2]
    tile_h, r, out_w, rc = o_ref.shape

    # --- im2col straight into the VMEM scratch (no 9-way concat / temps) ---
    for kh in range(3):
        for kw in range(3):
            tap = x_ref[kh:kh + tile_h, kw:kw + out_w, :]          # (TH, W, Cin)
            col = (kh * 3 + kw) * cin
            lhs_ref[:, col:col + cin] = tap.reshape(tile_h * out_w, cin)

    # --- one full-width MXU matmul over all Cout = r*r*C output channels ---
    acc = jnp.dot(lhs_ref[...], w_ref[...],
                  preferred_element_type=jnp.float32)              # (TH*W, Cout) f32
    acc = acc + b_ref[...]                                         # f32 bias
    alpha = alpha_ref[0]
    acc = jnp.where(acc > 0, acc, alpha * acc)                     # PReLU (f32)
    acc = acc.astype(o_ref.dtype)                                  # single narrow cast

    # --- fused PixelShuffle: columns are (i, j, c); for fixed i the slice is
    #     row-major identical to output rows h*r+i laid out as (TH, W, r*C) ---
    for i in range(r):
        blk = acc[:, i * rc:(i + 1) * rc]                          # (TH*W, r*C)
        o_ref[:, i:i + 1, :, :] = blk.reshape(tile_h, 1, out_w, rc)


def _vmem_capacity_bytes():
    """Physical VMEM per core; conservative 64 MiB fallback (v7x per-TC)."""
    try:
        info = pltpu.get_tpu_info()
        cap = int(getattr(info, "vmem_capacity_bytes", 0))
        if cap > 0:
            return cap
    except Exception:
        pass
    return 64 * 2**20


def _tile_vmem_bytes(th, w, cin, c, r, out_itemsize):
    """ALL per-step kernel VMEM: double-buffered in/out tiles + im2col LHS
    scratch + f32 matmul accumulator + its narrow cast copy."""
    cout = c * r * r
    in_tile = (th + 2) * (w + 2) * cin * 2          # bf16 input tile
    out_tile = th * r * w * r * c * out_itemsize    # output tile
    lhs = th * w * 9 * cin * 2                      # bf16 im2col scratch
    acc_f32 = th * w * cout * 4                     # f32 matmul result
    acc_lo = th * w * cout * out_itemsize           # cast copy before stores
    return 2 * (in_tile + out_tile) + lhs + acc_f32 + acc_lo


def _choose_tile_h(n, h, w, cin, c, r, out_itemsize, budget_bytes):
    """Largest divisor of H whose full per-step VMEM footprint fits the budget,
    preferring >=4 total grid steps (>=2 per TensorCore on megacore), else >=2."""
    divs = [d for d in range(1, h + 1) if h % d == 0]
    fitting = [d for d in divs
               if _tile_vmem_bytes(d, w, cin, c, r, out_itemsize) <= budget_bytes]
    fitting = fitting or [1]
    for min_steps in (4, 2):
        cands = [d for d in fitting if n * (h // d) >= min_steps]
        if cands:
            return max(cands)
    return max(fitting)


def upsample_block(x_nchw, weight_oihw, bias, alpha, up_scale,
                   out_dtype=jnp.float32, kernel_out_dtype=jnp.bfloat16):
    """Forward pass of SRGAN UpsampleBlock (PyTorch NCHW / OIHW conventions).

    Inputs/weights are cast to bf16 for the MXU (f32 accumulation) and the
    kernel writes bf16 -- an intentional accuracy trade vs. PyTorch f32 conv.
    """
    n, cin, h, w = x_nchw.shape
    r = int(up_scale)
    c = cin                       # channels after pixel shuffle
    cout = c * r * r
    assert weight_oihw.shape == (cout, cin, 3, 3)

    # ---- weights: OIHW -> HWIO, out channels reordered (c,i,j) -> (i,j,c),
    #      flattened to the im2col matrix (9*Cin, Cout). bf16 for MXU/DMA.
    w_hwio = jnp.transpose(weight_oihw, (2, 3, 1, 0))        # (3,3,Cin,Cout)
    w_hwio = w_hwio.reshape(3, 3, cin, c, r, r)              # [..., c, i, j]
    w_hwio = jnp.transpose(w_hwio, (0, 1, 2, 4, 5, 3))       # [..., i, j, c]
    w2d = w_hwio.reshape(9 * cin, cout).astype(jnp.bfloat16)

    b_r = jnp.transpose(bias.reshape(c, r, r), (1, 2, 0))    # [i, j, c]
    b_r = b_r.reshape(1, cout).astype(jnp.float32)
    alpha1 = jnp.asarray(alpha, jnp.float32).reshape(1)

    # ---- input: NCHW -> NHWC bf16, zero-pad by 1
    x = jnp.transpose(x_nchw, (0, 2, 3, 1)).astype(jnp.bfloat16)
    x_pad = jnp.pad(x, ((0, 0), (1, 1), (1, 1), (0, 0)))

    # ---- per-generation VMEM budget / scoped limit
    ker_itemsize = jnp.dtype(kernel_out_dtype).itemsize
    cap = _vmem_capacity_bytes()
    cap_limit = max(32 * 2**20, min(100 * 2**20, cap - 16 * 2**20))
    w_bufs = 2 * (9 * cin * cout * 2) + 2 * (cout * 4)       # double-buffered w/b
    margin = 4 * 2**20                                       # compiler scratch / relayouts
    budget = max(1 * 2**20, min(16 * 2**20, cap_limit - w_bufs - margin))

    th = _choose_tile_h(n, h, w, cin, c, r, ker_itemsize, budget)
    nhb = h // th
    vmem_limit = int(min(cap_limit,
                         max(16 * 2**20,
                             _tile_vmem_bytes(th, w, cin, c, r, ker_itemsize)
                             + w_bufs + margin)))

    # ---- halo'd non-overlapping row tiles of the (smallest) padded input.
    # TODO(synk): replace with an in-kernel manual DMA of an overlapping
    # pl.ds window from an HBM ref (memory_space=pl.ANY) to drop this copy.
    if nhb == 1:
        x_blocks = x_pad.reshape(n, 1, h + 2, w + 2, cin)    # free reshape
    else:
        x_blocks = jnp.stack(
            [x_pad[:, i * th:i * th + th + 2] for i in range(nhb)], axis=1)

    out = pl.pallas_call(
        upsample_block_kernel,
        grid=(n, nhb),
        in_specs=[
            pl.BlockSpec((None, None, th + 2, w + 2, cin),
                         lambda ni, hi: (ni, hi, 0, 0, 0)),
            pl.BlockSpec((9 * cin, cout), lambda ni, hi: (0, 0)),
            pl.BlockSpec((1, cout), lambda ni, hi: (0, 0)),
            pl.BlockSpec(memory_space=pltpu.MemorySpace.SMEM),
        ],
        out_specs=pl.BlockSpec((None, th, r, w, r * c),
                               lambda ni, hi: (ni, hi, 0, 0, 0)),
        out_shape=jax.ShapeDtypeStruct((n, h, r, w, r * c), kernel_out_dtype),
        scratch_shapes=[pltpu.VMEM((th * w, 9 * cin), jnp.bfloat16)],
        compiler_params=pltpu.CompilerParams(
            dimension_semantics=("parallel", "parallel"),
            vmem_limit_bytes=vmem_limit),
    )(x_blocks, w2d, b_r, alpha1)

    # (N, H, r, W, r*C) is row-major identical to (N, H*r, W*r, C): free reshape.
    out = out.reshape(n, h * r, w * r, c)
    # TODO(synk): if the consumer can stay NHWC/bf16, return `out` here and skip
    # this transpose+cast (an extra HBM pass over the largest tensor).
    return jnp.transpose(out, (0, 3, 1, 2)).astype(out_dtype)   # NHWC -> NCHW, f32


if __name__ == "__main__":
    key = jax.random.PRNGKey(0)
    in_channels, up_scale = 4, 2
    N, H, W = 2, 16, 16
    Cout = in_channels * up_scale ** 2

    k_x, k_w, k_b = jax.random.split(key, 3)
    x = jax.random.normal(k_x, (N, in_channels, H, W), jnp.float32)

    # Deterministic synthetic init (PyTorch Conv2d-style uniform bounds).
    fan_in = in_channels * 3 * 3
    bound = 1.0 / (fan_in ** 0.5)
    weight = jax.random.uniform(k_w, (Cout, in_channels, 3, 3),
                                jnp.float32, -bound, bound)
    bias = jax.random.uniform(k_b, (Cout,), jnp.float32, -bound, bound)
    alpha = jnp.float32(0.25)          # nn.PReLU() default init

    fn = jax.jit(upsample_block, static_argnames=("up_scale",))
    out = fn(x, weight, bias, alpha, up_scale=up_scale)
    out = jax.block_until_ready(out)

    # Pure-JAX reference on the same bf16-rounded inputs (f32 accumulation).
    xq = x.astype(jnp.bfloat16).astype(jnp.float32)
    wq = weight.astype(jnp.bfloat16).astype(jnp.float32)
    ref_conv = jax.lax.conv_general_dilated(
        xq, wq, window_strides=(1, 1), padding=((1, 1), (1, 1)),
        dimension_numbers=("NCHW", "OIHW", "NCHW"),
        precision=jax.lax.Precision.HIGHEST) + bias.reshape(1, Cout, 1, 1)
    r = up_scale
    ref_ps = ref_conv.reshape(N, in_channels, r, r, H, W)
    ref_ps = jnp.transpose(ref_ps, (0, 1, 4, 2, 5, 3)).reshape(
        N, in_channels, H * r, W * r)
    ref = jnp.where(ref_ps > 0, ref_ps, alpha * ref_ps)

    assert out.shape == (N, in_channels, H * r, W * r)
    max_err = float(jnp.max(jnp.abs(out - ref)))
    # Tolerance covers the intentional bf16 input/weight/output rounding.
    assert jnp.allclose(out, ref, atol=1e-2, rtol=1e-2), \
        f"mismatch vs reference (max err {max_err})"
    print("KERNEL_OK")
</pallas_src>

<mosaic_0001>
module attributes {stable_mosaic.version = 11 : i64} {
  func.func @upsample_block_kernel(%arg0: i32, %arg1: i32, %arg2: memref<1x1x10x18x4xbf16, #tpu.memory_space<vmem>>, %arg3: memref<36x16xbf16, #tpu.memory_space<vmem>>, %arg4: memref<1x16xf32, #tpu.memory_space<vmem>>, %arg5: memref<1xf32, #tpu.memory_space<smem>>, %arg6: memref<1x8x2x16x8xbf16, #tpu.memory_space<vmem>>, %arg7: memref<128x36xbf16, #tpu.memory_space<vmem>>) attributes {dimension_semantics = [#tpu.dimension_semantics<parallel>, #tpu.dimension_semantics<parallel>], iteration_bounds = array<i64: 2, 2>, scalar_prefetch = 0 : i64, scratch_operands = 1 : i64, tpu.core_type = #tpu.core_type<tc>, window_params = [{transform_indices = @transform_0, window_bounds = array<i64: 1, 1, 10, 18, 4>}, {pipeline_mode = #tpu.pipeline_mode<synchronous>, transform_indices = @transform_1, window_bounds = array<i64: 36, 16>}, {pipeline_mode = #tpu.pipeline_mode<synchronous>, transform_indices = @transform_2, window_bounds = array<i64: 1, 16>}, {transform_indices = @transform_3, window_bounds = array<i64: 1>}, {transform_indices = @transform_4, window_bounds = array<i64: 1, 8, 2, 16, 8>}]} {
    %c0 = arith.constant 0 : index
    %c0_0 = arith.constant 0 : index
    %c0_1 = arith.constant 0 : index
    %c0_2 = arith.constant 0 : index
    %c0_3 = arith.constant 0 : index
    %0 = vector.load %arg2[%c0, %c0_0, %c0_1, %c0_2, %c0_3] : memref<1x1x10x18x4xbf16, #tpu.memory_space<vmem>>, vector<1x1x8x16x4xbf16>
    %1 = vector.shape_cast %0 : vector<1x1x8x16x4xbf16> to vector<8x16x4xbf16>
    %2 = vector.shape_cast %1 : vector<8x16x4xbf16> to vector<128x4xbf16>
    %c0_4 = arith.constant 0 : index
    %c0_5 = arith.constant 0 : index
    %3 = vector.load %arg7[%c0_4, %c0_5] : memref<128x36xbf16, #tpu.memory_space<vmem>>, vector<128x4xbf16>
    tpu.vector_store %arg7[%c0_4, %c0_5], %2 {strides = array<i32>} : memref<128x36xbf16, #tpu.memory_space<vmem>>, vector<128x4xbf16>,
    %c0_6 = arith.constant 0 : index
    %c0_7 = arith.constant 0 : index
    %c0_8 = arith.constant 0 : index
    %c1 = arith.constant 1 : index
    %c0_9 = arith.constant 0 : index
    %4 = vector.load %arg2[%c0_6, %c0_7, %c0_8, %c1, %c0_9] : memref<1x1x10x18x4xbf16, #tpu.memory_space<vmem>>, vector<1x1x8x16x4xbf16>
    %5 = vector.shape_cast %4 : vector<1x1x8x16x4xbf16> to vector<8x16x4xbf16>
    %6 = vector.shape_cast %5 : vector<8x16x4xbf16> to vector<128x4xbf16>
    %c0_10 = arith.constant 0 : index
    %c4 = arith.constant 4 : index
    %7 = vector.load %arg7[%c0_10, %c4] : memref<128x36xbf16, #tpu.memory_space<vmem>>, vector<128x4xbf16>
    tpu.vector_store %arg7[%c0_10, %c4], %6 {strides = array<i32>} : memref<128x36xbf16, #tpu.memory_space<vmem>>, vector<128x4xbf16>,
    %c0_11 = arith.constant 0 : index
    %c0_12 = arith.constant 0 : index
    %c0_13 = arith.constant 0 : index
    %c2 = arith.constant 2 : index
    %c0_14 = arith.constant 0 : index
    %8 = vector.load %arg2[%c0_11, %c0_12, %c0_13, %c2, %c0_14] : memref<1x1x10x18x4xbf16, #tpu.memory_space<vmem>>, vector<1x1x8x16x4xbf16>
    %9 = vector.shape_cast %8 : vector<1x1x8x16x4xbf16> to vector<8x16x4xbf16>
    %10 = vector.shape_cast %9 : vector<8x16x4xbf16> to vector<128x4xbf16>
    %c0_15 = arith.constant 0 : index
    %c8 = arith.constant 8 : index
    %11 = vector.load %arg7[%c0_15, %c8] : memref<128x36xbf16, #tpu.memory_space<vmem>>, vector<128x4xbf16>
    tpu.vector_store %arg7[%c0_15, %c8], %10 {strides = array<i32>} : memref<128x36xbf16, #tpu.memory_space<vmem>>, vector<128x4xbf16>,
    %c0_16 = arith.constant 0 : index
    %c0_17 = arith.constant 0 : index
    %c1_18 = arith.constant 1 : index
    %c0_19 = arith.constant 0 : index
    %c0_20 = arith.constant 0 : index
    %12 = vector.load %arg2[%c0_16, %c0_17, %c1_18, %c0_19, %c0_20] : memref<1x1x10x18x4xbf16, #tpu.memory_space<vmem>>, vector<1x1x8x16x4xbf16>
    %13 = vector.shape_cast %12 : vector<1x1x8x16x4xbf16> to vector<8x16x4xbf16>
    %14 = vector.shape_cast %13 : vector<8x16x4xbf16> to vector<128x4xbf16>
    %c0_21 = arith.constant 0 : index
    %c12 = arith.constant 12 : index
    %15 = vector.load %arg7[%c0_21, %c12] : memref<128x36xbf16, #tpu.memory_space<vmem>>, vector<128x4xbf16>
    tpu.vector_store %arg7[%c0_21, %c12], %14 {strides = array<i32>} : memref<128x36xbf16, #tpu.memory_space<vmem>>, vector<128x4xbf16>,
    %c0_22 = arith.constant 0 : index
    %c0_23 = arith.constant 0 : index
    %c1_24 = arith.constant 1 : index
    %c1_25 = arith.constant 1 : index
    %c0_26 = arith.constant 0 : index
    %16 = vector.load %arg2[%c0_22, %c0_23, %c1_24, %c1_25, %c0_26] : memref<1x1x10x18x4xbf16, #tpu.memory_space<vmem>>, vector<1x1x8x16x4xbf16>
    %17 = vector.shape_cast %16 : vector<1x1x8x16x4xbf16> to vector<8x16x4xbf16>
    %18 = vector.shape_cast %17 : vector<8x16x4xbf16> to vector<128x4xbf16>
    %c0_27 = arith.constant 0 : index
    %c16 = arith.constant 16 : index
    %19 = vector.load %arg7[%c0_27, %c16] : memref<128x36xbf16, #tpu.memory_space<vmem>>, vector<128x4xbf16>
    tpu.vector_store %arg7[%c0_27, %c16], %18 {strides = array<i32>} : memref<128x36xbf16, #tpu.memory_space<vmem>>, vector<128x4xbf16>,
    %c0_28 = arith.constant 0 : index
    %c0_29 = arith.constant 0 : index
    %c1_30 = arith.constant 1 : index
    %c2_31 = arith.constant 2 : index
    %c0_32 = arith.constant 0 : index
    %20 = vector.load %arg2[%c0_28, %c0_29, %c1_30, %c2_31, %c0_32] : memref<1x1x10x18x4xbf16, #tpu.memory_space<vmem>>, vector<1x1x8x16x4xbf16>
    %21 = vector.shape_cast %20 : vector<1x1x8x16x4xbf16> to vector<8x16x4xbf16>
    %22 = vector.shape_cast %21 : vector<8x16x4xbf16> to vector<128x4xbf16>
    %c0_33 = arith.constant 0 : index
    %c20 = arith.constant 20 : index
    %23 = vector.load %arg7[%c0_33, %c20] : memref<128x36xbf16, #tpu.memory_space<vmem>>, vector<128x4xbf16>
    tpu.vector_store %arg7[%c0_33, %c20], %22 {strides = array<i32>} : memref<128x36xbf16, #tpu.memory_space<vmem>>, vector<128x4xbf16>,
    %c0_34 = arith.constant 0 : index
    %c0_35 = arith.constant 0 : index
    %c2_36 = arith.constant 2 : index
    %c0_37 = arith.constant 0 : index
    %c0_38 = arith.constant 0 : index
    %24 = vector.load %arg2[%c0_34, %c0_35, %c2_36, %c0_37, %c0_38] : memref<1x1x10x18x4xbf16, #tpu.memory_space<vmem>>, vector<1x1x8x16x4xbf16>
    %25 = vector.shape_cast %24 : vector<1x1x8x16x4xbf16> to vector<8x16x4xbf16>
    %26 = vector.shape_cast %25 : vector<8x16x4xbf16> to vector<128x4xbf16>
    %c0_39 = arith.constant 0 : index
    %c24 = arith.constant 24 : index
    %27 = vector.load %arg7[%c0_39, %c24] : memref<128x36xbf16, #tpu.memory_space<vmem>>, vector<128x4xbf16>
    tpu.vector_store %arg7[%c0_39, %c24], %26 {strides = array<i32>} : memref<128x36xbf16, #tpu.memory_space<vmem>>, vector<128x4xbf16>,
    %c0_40 = arith.constant 0 : index
    %c0_41 = arith.constant 0 : index
    %c2_42 = arith.constant 2 : index
    %c1_43 = arith.constant 1 : index
    %c0_44 = arith.constant 0 : index
    %28 = vector.load %arg2[%c0_40, %c0_41, %c2_42, %c1_43, %c0_44] : memref<1x1x10x18x4xbf16, #tpu.memory_space<vmem>>, vector<1x1x8x16x4xbf16>
    %29 = vector.shape_cast %28 : vector<1x1x8x16x4xbf16> to vector<8x16x4xbf16>
    %30 = vector.shape_cast %29 : vector<8x16x4xbf16> to vector<128x4xbf16>
    %c0_45 = arith.constant 0 : index
    %c28 = arith.constant 28 : index
    %31 = vector.load %arg7[%c0_45, %c28] : memref<128x36xbf16, #tpu.memory_space<vmem>>, vector<128x4xbf16>
    tpu.vector_store %arg7[%c0_45, %c28], %30 {strides = array<i32>} : memref<128x36xbf16, #tpu.memory_space<vmem>>, vector<128x4xbf16>,
    %c0_46 = arith.constant 0 : index
    %c0_47 = arith.constant 0 : index
    %c2_48 = arith.constant 2 : index
    %c2_49 = arith.constant 2 : index
    %c0_50 = arith.constant 0 : index
    %32 = vector.load %arg2[%c0_46, %c0_47, %c2_48, %c2_49, %c0_50] : memref<1x1x10x18x4xbf16, #tpu.memory_space<vmem>>, vector<1x1x8x16x4xbf16>
    %33 = vector.shape_cast %32 : vector<1x1x8x16x4xbf16> to vector<8x16x4xbf16>
    %34 = vector.shape_cast %33 : vector<8x16x4xbf16> to vector<128x4xbf16>
    %c0_51 = arith.constant 0 : index
    %c32 = arith.constant 32 : index
    %35 = vector.load %arg7[%c0_51, %c32] : memref<128x36xbf16, #tpu.memory_space<vmem>>, vector<128x4xbf16>
    tpu.vector_store %arg7[%c0_51, %c32], %34 {strides = array<i32>} : memref<128x36xbf16, #tpu.memory_space<vmem>>, vector<128x4xbf16>,
    %c0_52 = arith.constant 0 : index
    %c0_53 = arith.constant 0 : index
    %36 = vector.load %arg7[%c0_52, %c0_53] : memref<128x36xbf16, #tpu.memory_space<vmem>>, vector<128x36xbf16>
    %c0_54 = arith.constant 0 : index
    %c0_55 = arith.constant 0 : index
    %37 = vector.load %arg3[%c0_54, %c0_55] : memref<36x16xbf16, #tpu.memory_space<vmem>>, vector<36x16xbf16>
    %cst = arith.constant dense<0.000000e+00> : vector<128x16xf32>
    %38 = tpu.matmul %36, %37, %cst {dimension_numbers = #tpu.dot_dimension_numbers<[1], [0], [0], [1], [0, 0, 1, 1], [], []>} : vector<128x36xbf16>, vector<36x16xbf16>, vector<128x16xf32> -> vector<128x16xf32>
    %c0_56 = arith.constant 0 : index
    %c0_57 = arith.constant 0 : index
    %39 = vector.load %arg4[%c0_56, %c0_57] : memref<1x16xf32, #tpu.memory_space<vmem>>, vector<1x16xf32>
    %40 = vector.broadcast %39 : vector<1x16xf32> to vector<128x16xf32>
    %41 = arith.addf %38, %40 : vector<128x16xf32>
    %c0_58 = arith.constant 0 : index
    %42 = memref.load %arg5[%c0_58] : memref<1xf32, #tpu.memory_space<smem>>
    %cst_59 = arith.constant 0.000000e+00 : f32
    %43 = vector.broadcast %cst_59 : f32 to vector<128x16xf32>
    %44 = arith.cmpf ogt, %41, %43 : vector<128x16xf32>
    %45 = vector.broadcast %42 : f32 to vector<128x16xf32>
    %46 = arith.mulf %45, %41 : vector<128x16xf32>
    %47 = arith.select %44, %41, %46 : vector<128x16xi1>, vector<128x16xf32>
    %48 = arith.truncf %47 : vector<128x16xf32> to vector<128x16xbf16>
    %49 = vector.extract_strided_slice %48 {offsets = [0, 0], sizes = [128, 8], strides = [1, 1]} : vector<128x16xbf16> to vector<128x8xbf16>
    %50 = vector.shape_cast %49 : vector<128x8xbf16> to vector<8x1x16x8xbf16>
    %c0_60 = arith.constant 0 : index
    %c0_61 = arith.constant 0 : index
    %c0_62 = arith.constant 0 : index
    %c0_63 = arith.constant 0 : index
    %c0_64 = arith.constant 0 : index
    %51 = vector.load %arg6[%c0_60, %c0_61, %c0_62, %c0_63, %c0_64] : memref<1x8x2x16x8xbf16, #tpu.memory_space<vmem>>, vector<1x8x1x16x8xbf16>
    %52 = vector.shape_cast %51 : vector<1x8x1x16x8xbf16> to vector<8x1x16x8xbf16>
    %53 = vector.shape_cast %50 : vector<8x1x16x8xbf16> to vector<1x8x1x16x8xbf16>
    tpu.vector_store %arg6[%c0_60, %c0_61, %c0_62, %c0_63, %c0_64], %53 {strides = array<i32>} : memref<1x8x2x16x8xbf16, #tpu.memory_space<vmem>>, vector<1x8x1x16x8xbf16>,
    %54 = vector.extract_strided_slice %48 {offsets = [0, 8], sizes = [128, 8], strides = [1, 1]} : vector<128x16xbf16> to vector<128x8xbf16>
    %55 = vector.shape_cast %54 : vector<128x8xbf16> to vector<8x1x16x8xbf16>
    %c0_65 = arith.constant 0 : index
    %c0_66 = arith.constant 0 : index
    %c1_67 = arith.constant 1 : index
    %c0_68 = arith.constant 0 : index
    %c0_69 = arith.constant 0 : index
    %56 = vector.load %arg6[%c0_65, %c0_66, %c1_67, %c0_68, %c0_69] : memref<1x8x2x16x8xbf16, #tpu.memory_space<vmem>>, vector<1x8x1x16x8xbf16>
    %57 = vector.shape_cast %56 : vector<1x8x1x16x8xbf16> to vector<8x1x16x8xbf16>
    %58 = vector.shape_cast %55 : vector<8x1x16x8xbf16> to vector<1x8x1x16x8xbf16>
    tpu.vector_store %arg6[%c0_65, %c0_66, %c1_67, %c0_68, %c0_69], %58 {strides = array<i32>} : memref<1x8x2x16x8xbf16, #tpu.memory_space<vmem>>, vector<1x8x1x16x8xbf16>,
    return
  }
  func.func @transform_0(%arg0: i32, %arg1: i32) -> (i32, i32, i32, i32, i32) {
    %c0_i32 = arith.constant 0 : i32
    %c0_i32_0 = arith.constant 0 : i32
    %c0_i32_1 = arith.constant 0 : i32
    %c0_i32_2 = arith.constant 0 : i32
    return %arg0, %arg1, %c0_i32, %c0_i32_0, %c0_i32_1 : i32, i32, i32, i32, i32
  }
  func.func @transform_1(%arg0: i32, %arg1: i32) -> (i32, i32) {
    %c0_i32 = arith.constant 0 : i32
    %c0_i32_0 = arith.constant 0 : i32
    %c0_i32_1 = arith.constant 0 : i32
    return %c0_i32, %c0_i32_0 : i32, i32
  }
  func.func @transform_2(%arg0: i32, %arg1: i32) -> (i32, i32) {
    %c0_i32 = arith.constant 0 : i32
    %c0_i32_0 = arith.constant 0 : i32
    %c0_i32_1 = arith.constant 0 : i32
    return %c0_i32, %c0_i32_0 : i32, i32
  }
  func.func @transform_3(%arg0: i32, %arg1: i32) -> i32 {
    %c0_i32 = arith.constant 0 : i32
    %c0_i32_0 = arith.constant 0 : i32
    return %c0_i32 : i32
  }
  func.func @transform_4(%arg0: i32, %arg1: i32) -> (i32, i32, i32, i32, i32) {
    %c0_i32 = arith.constant 0 : i32
    %c0_i32_0 = arith.constant 0 : i32
    %c0_i32_1 = arith.constant 0 : i32
    %c0_i32_2 = arith.constant 0 : i32
    return %arg0, %arg1, %c0_i32, %c0_i32_0, %c0_i32_1 : i32, i32, i32, i32, i32
  }
}

</mosaic_0001>

<bundles_post_ra>
// kernel: upsample_block.1
= control target key start
LH: loop header
LB: loop body
LE: loop exit
PB: predicated region body
PF: predicated region fallthrough
CT: control target
= control target key end

     0   :  { %s2621_s17 = smov 0   ;;  %s2623_s18 = smov 0   ;;  %s3531_s0 = inlined_call_operand.vmem [shape: bf16[2,2,10,18,4], index: 0, kind: input, shape index: {}]   ;;  %s3532_s1 = inlined_call_operand.vmem [shape: bf16[36,16], index: 1, kind: input, shape index: {}]   ;;  %s3533_s2 = inlined_call_operand.vmem [shape: f32[1,16], index: 2, kind: input, shape index: {}]   ;;  %s3534_s3 = inlined_call_operand.<no memory space> [shape: f32[1], index: 3, kind: input, shape index: {}]   ;;  %s3535_s4 = inlined_call_operand.vmem [shape: bf16[2,16,2,16,8], index: 4, kind: output, shape index: {}]  }
   0x1   :  { %9 = sst [smem:[#allocation3]] %s3534_s3  ;;  %s2625_s19 = smov 0  }
   0x2   :  { %s2627_s20 = smov 0   ;;  %s2629_s21 = smov 0  }
   0x3 LB: > { %s24_s3 = sadd.s32 1, %s2574_s19  ;;  %s27_s22 = sadd.s32 1, %s2578_s20  ;;  %s2582_s21 = sphi %s2629_s21, %s15_s21   ;;  %s2578_s20 = sphi %s2627_s20, %s3543_s20   ;;  %s2574_s19 = sphi %s2625_s19, %s3542_s19   ;;  %s2570_s18 = sphi %s2623_s18, %s3541_s18   ;;  %s2566_s17 = sphi %s2621_s17, %s3540_s17  }
   0x4   : > { %p25_p0 = scmp.ge.s32.totalorder %s24_s3, 2  ;;  %p2249_p1 = scmp.ge.s32.totalorder %s2582_s21, 1 }
   0x5   : > { %p183_p2 = scmp.lt.s32.totalorder %s2582_s21, 5 }
   0x6   : > { %s3545_s3 = smov (%p25_p0, %s24_s3), 0  ;;  %s3547_s22 = smov (!%p25_p0, %s27_s22), %s2578_s20 }
   0x7   : > { %p184_p3 = pnand %p2249_p1, %p183_p2  ;;  %p29_p4 = scmp.ge.s32.totalorder %s3547_s22, 2 }
   0x8   : > { %p218_p5 = scmp.lt.s32.totalorder (!%p184_p3), %s2570_s18, 1  ;;  %p220_p6 = scmp.lt.s32.totalorder (!%p184_p3), %s2566_s17, 1 }
   0x9   : > { %s3549_s22 = smov (%p29_p4, %s3547_s22), 0  ;;  %187 = sbr.rel (%p184_p3) target bundleno = 765 (0x2fd), region = 36 }
   0xa   : > { %s2584_s5 = smov (!%p184_p3), 4   ;;  %s2585_s6 = smov (!%p184_p3), 8  }
   0xb   : > { %s2586_s7 = smov (!%p184_p3), 12   ;;  %s2587_s8 = smov (!%p184_p3), 16  }
   0xc   : > { %s2588_s9 = smov (!%p184_p3), 20   ;;  %s2589_s10 = smov (!%p184_p3), 24  }
   0xd   : > { %s2590_s11 = smov (!%p184_p3), 28   ;;  %s2591_s12 = smov (!%p184_p3), 32  }
   0xe   : > { %s3551_s18 = smov (!%p218_p5, %s2570_s18), 1  ;;  %vm296_vm0 = vsmask.f32 3328  ;;  %vm297_vm1 = vsmask.f32 7440  ;;  %vm604_vm3 = vcmask 1042432  }
   0xf   : > { %s221_s23 = scalar_select %p220_p6, %s2566_s17, 1  ;;  %vm2672_vm2 = vmor %vm296_vm0, %vm297_vm1  ;;  %vm605_vm4 = vcmask 1046532   ;;  %vm255_vm6 = vcmask 27648   ;;  %vm539_vm7 = vcmask 60448   ;;  %vm711_vm8 = vcmask 93248  }
  0x10   : > { %s2493_s24 = smul.u32 60, %s3551_s18  ;;  %vm2740_vm5 = vmor %vm604_vm3, %vm605_vm4  ;;  %vm809_vm9 = vcmask 126048   ;;  %vm1090_vm10 = vcmask 158848   ;;  %vm1259_vm11 = vcmask 191648   ;;  %vm1929_vm12 = vcmask 1041408   ;;  %s2253_s28 = sshll.u32 %s3551_s18, 6 }
  0x11   : > { %s2492_s25 = smul.u32 30, %s221_s23  ;;  %vm1357_vm13 = vcmask 224448   ;;  %vm1638_vm14 = vcmask 257248   ;;  %vm1807_vm15 = vcmask 290048   ;;  %vm1904_vm0 = vcmask 293888  }
  0x13   : > { %s224_s26 = sadd.s32 %s2493_s24, %s2492_s25  ;;  %s2251_s25 = sshll.u32 %s2566_s17, 3 }
  0x14   : > { %s2250_s27 = sshll.u32 %s224_s26, 2  ;;  %p230_p7 = scmp.lt.s32.totalorder %s2251_s25, 15 }
  0x15   : > { %s2661_s30 = scalar_lea.vmem %s3531_s0, %s2250_s27  ;;  %s1982_s26 = sld [smem:[#allocation3]] }
  0x16   : > { %v275_v0 = vld [vmem:[%s2661_s30 + $0xc] sm:$0xf]  ;;  %v276_v1 = vld [vmem:[%s2661_s30 + $0x10] sm:$0xf]  ;;  %v272_v2 = vld [vmem:[%s2661_s30] sm:$0xf] }
  0x17   : > { %v324_v3 = vshrl.u32 %v275_v0, 16  ;;  %v327_v4 = vshll.u32 %v275_v0, 16  ;;  %v333_v5 = vshll.u32 %v276_v1, 16  ;;  %v337_v6 = vshrl.u32 %v276_v1, 16  ;;  %v273_v7 = vld [vmem:[%s2661_s30 + $0x4] sm:$0xf] }
  0x18   : > { %v300_v8 = vshrl.u32 %v272_v2, 16  ;;  %v303_v9 = vshll.u32 %v272_v2, 16  ;;  %v309_v10 = vshll.u32 %v273_v7, 16  ;;  %v313_v11 = vshrl.u32 %v273_v7, 16  ;;  %v277_v12 = vld [vmem:[%s2661_s30 + $0x14] sm:$0x1] }
  0x19   : > { %v326_v13 = vrot.slane %v324_v3, 4  ;;  %v329_v14 = vrot.slane %v327_v4, 5  ;;  %v335_v15 = vrot.slane %v333_v5, 5  ;;  %v339_v16 = vrot.slane %v337_v6, 4  ;;  %v274_v17 = vld [vmem:[%s2661_s30 + $0x8] sm:$0x1] }
  0x1a   : > { %v302_v18 = vrot.slane %v300_v8, 4  ;;  %v305_v19 = vrot.slane %v303_v9, 5  ;;  %v315_v20 = vrot.slane %v313_v11, 4  ;;  %v282_v21 = vld [vmem:[%s2661_s30 + $0x28] sm:$0xf]  ;;  %v311_v23 = vrot.slane %v309_v10, 5 }
  0x1b   : > { %v330_v22 = vor.u32 %v329_v14, %v326_v13  ;;  %v340_v24 = vor.u32 %v339_v16, %v335_v15  ;;  %v343_v27 = vshll.u32 %v277_v12, 16  ;;  %v381_v28 = vshll.u32 %v282_v21, 16  ;;  %v281_v30 = vld [vmem:[%s2661_s30 + $0x24] sm:$0xf]  ;;  %v278_v35 = vld [vmem:[%s2661_s30 + $0x18] sm:$0xf] }
  0x1c   : > { %v306_v26 = vor.u32 %v305_v19, %v302_v18  ;;  %v385_v29 = vshrl.u32 %v282_v21, 16  ;;  %v316_v32 = vor.u32 %v315_v20, %v311_v23  ;;  %v319_v33 = vshll.u32 %v274_v17, 16  ;;  %v279_v40 = vld [vmem:[%s2661_s30 + $0x1c] sm:$0xf]  ;;  %v283_v44 = vld [vmem:[%s2661_s30 + $0x2c] sm:$0x1] }
  0x1d   : > { %v331_v31 = vrot.slane %v330_v22, 4  ;;  %v2680_v37 = vrot.slane %v381_v28, 5  ;;  %v372_v39 = vshrl.u32 %v281_v30, 16  ;;  %v341_v42 = vrot.slane %v340_v24, 4  ;;  %v287_v50 = vld [vmem:[%s2661_s30 + $0x3c] sm:$0xf] }
  0x1e   : > { %v307_v34 = vrot.slane %v306_v26, 4  ;;  %v387_v38 = vrot.slane %v385_v29, 4  ;;  %v345_v43 = vrot.slane %v343_v27, 5  ;;  %v375_v45 = vshll.u32 %v281_v30, 16  ;;  %v285_v59 = vld [vmem:[%s2661_s30 + $0x34] sm:$0xf] }
  0x1f   : > { %v336_v36 = vsel %vm2672_vm2, %v331_v31, %v335_v15  ;;  %v317_v46 = vrot.slane %v316_v32, 4  ;;  %v321_v47 = vrot.slane %v319_v33, 5  ;;  %v348_v48 = vshrl.u32 %v278_v35, 16  ;;  %v280_v6 = vld [vmem:[%s2661_s30 + $0x20] sm:$0x1]  ;;  %s3553_s25 = smov (!%p230_p7, %s2251_s25), 15 }
  0x20   : > { %495 = vrot.lane.b32.xlu1 %v336_v36, %s2584_s5  ;;  %v312_v41 = vsel %vm2672_vm2, %v307_v34, %v311_v23  ;;  %v351_v49 = vshll.u32 %v278_v35, 16  ;;  %v374_v51 = vrot.slane %v372_v39, 4  ;;  %v377_v52 = vrot.slane %v375_v45, 5  ;;  %v288_v10 = vld [vmem:[%s2661_s30 + $0x40] sm:$0xf]  ;;  %s2252_s27 = sshll.u32 %s3553_s25, 2 }
  0x21   : > { %491 = vrot.lane.b32.xlu0 %v312_v41, %s2584_s5  ;;  %v357_v53 = vshll.u32 %v279_v40, 16  ;;  %v361_v54 = vshrl.u32 %v279_v40, 16  ;;  %v388_v55 = vor.u32 %v387_v38, %v2680_v37  ;;  %v391_v56 = vshll.u32 %v283_v44, 16  ;;  %v286_v15 = vld [vmem:[%s2661_s30 + $0x38] sm:$0x1] }
  0x22   : > { %v350_v57 = vrot.slane %v348_v48, 4  ;;  %v353_v58 = vrot.slane %v351_v49, 5  ;;  %v420_v61 = vshrl.u32 %v287_v50, 16  ;;  %v423_v62 = vshll.u32 %v287_v50, 16  ;;  %v291_v20 = vld [vmem:[%s2661_s30 + $0x4c] sm:$0xf] }
  0x23   : > { %v363_v60 = vrot.slane %v361_v54, 4  ;;  %v346_v63 = vsel %vm2672_vm2, %v341_v42, %v345_v43  ;;  %v359_v1 = vrot.slane %v357_v53, 5  ;;  %v322_v2 = vsel %vm2672_vm2, %v317_v46, %v321_v47  ;;  %v284_v21 = vld [vmem:[%s2661_s30 + $0x30] sm:$0xf]  ;;  %v290_v26 = vld [vmem:[%s2661_s30 + $0x48] sm:$0xf] }
  0x24   : > { %v354_v0 = vor.u32 %v353_v58, %v350_v57  ;;  %v378_v3 = vor.u32 %v377_v52, %v374_v51  ;;  %v405_v4 = vshll.u32 %v285_v59, 16  ;;  %v409_v5 = vshrl.u32 %v285_v59, 16  ;;  %v292_v48 = vld [vmem:[%s2661_s30 + $0x50] sm:$0x1]  ;;  %v294_v53 = vld [vmem:[%s2661_s30 + $0x58] sm:$0xf] }
  0x25   : > { %v389_v7 = vrot.slane %v388_v55, 4  ;;  %v393_v8 = vrot.slane %v391_v56, 5  ;;  %v422_v11 = vrot.slane %v420_v61, 4  ;;  %v425_v12 = vrot.slane %v423_v62, 5  ;;  %v289_v55 = vld [vmem:[%s2661_s30 + $0x44] sm:$0x1] }
  0x26   : > { %v355_v9 = vrot.slane %v354_v0, 4  ;;  %v364_v13 = vor.u32 %v363_v60, %v359_v1  ;;  %v407_v16 = vrot.slane %v405_v4, 5  ;;  %v411_v17 = vrot.slane %v409_v5, 4  ;;  %v293_v56 = vld [vmem:[%s2661_s30 + $0x54] sm:$0xf] }
  0x27   : > { %v367_v18 = vshll.u32 %v280_v6, 16  ;;  %v379_v19 = vrot.slane %v378_v3, 4  ;;  %v394_v22 = vsel %vm2672_vm2, %v389_v7, %v393_v8  ;;  %v426_v27 = vor.u32 %v425_v12, %v422_v11 }
  0x28   : > { %497 = vrot.lane.b32.xlu1 %v346_v63, %s2584_s5  ;;  %v360_v14 = vsel %vm2672_vm2, %v355_v9, %v359_v1  ;;  %v365_v23 = vrot.slane %v364_v13, 4  ;;  %v429_v28 = vshll.u32 %v288_v10, 16  ;;  %v433_v29 = vshrl.u32 %v288_v10, 16  ;;  %v295_v10 = vld [vmem:[%s2661_s30 + $0x5c] sm:$0x1] }
  0x29   : > { %493 = vrot.lane.b32.xlu0 %v322_v2, %s2584_s5  ;;  %499 = vrot.lane.b32.xlu2 %v360_v14, %s2584_s5  ;;  %v369_v24 = vrot.slane %v367_v18, 5  ;;  %v415_v30 = vshll.u32 %v286_v15, 16  ;;  %v412_v31 = vor.u32 %v411_v17, %v407_v16  ;;  %v453_v32 = vshll.u32 %v291_v20, 16  ;;  %v556_v17 = vld [vmem:[%s2661_s30] sm:$0xe] }
  0x2a   : > { %v457_v33 = vshrl.u32 %v291_v20, 16  ;;  %v396_v34 = vshrl.u32 %v284_v21, 16  ;;  %v384_v35 = vsel %vm2672_vm2, %v379_v19, %v2680_v37  ;;  %v444_v36 = vshrl.u32 %v290_v26, 16  ;;  %v557_v18 = vld [vmem:[%s2661_s30 + $0x4] sm:$0xf] }
  0x2b   : > { %v447_v38 = vshll.u32 %v290_v26, 16  ;;  %v399_v39 = vshll.u32 %v284_v21, 16  ;;  %v370_v40 = vsel %vm2672_vm2, %v365_v23, %v369_v24  ;;  %v427_v42 = vrot.slane %v426_v27, 4 }
  0x2c   : > { %v398_v41 = vrot.slane %v396_v34, 4  ;;  %v431_v43 = vrot.slane %v429_v28, 5  ;;  %v413_v45 = vrot.slane %v412_v31, 4  ;;  %v417_v37 = vrot.slane %v415_v30, 5  ;;  %v561_v34 = vld [vmem:[%s2661_s30 + $0x14] sm:$0x1] }
  0x2d   : > { %v401_v44 = vrot.slane %v399_v39, 5  ;;  %v455_v46 = vrot.slane %v453_v32, 5  ;;  %v459_v47 = vrot.slane %v457_v33, 4  ;;  %v446_v49 = vrot.slane %v444_v36, 4 }
  0x2e   : > { %v449_v50 = vrot.slane %v447_v38, 5  ;;  %v435_v52 = vrot.slane %v433_v29, 4  ;;  %v432_v57 = vsel %vm2672_vm2, %v427_v42, %v431_v43  ;;  %v418_v58 = vsel %vm2672_vm2, %v413_v45, %v417_v37  ;;  %v560_v29 = vld [vmem:[%s2661_s30 + $0x10] sm:$0xf]  ;;  %v558_v38 = vld [vmem:[%s2661_s30 + $0x8] sm:$0x1] }
  0x2f   : > { %v402_v51 = vor.u32 %v401_v44, %v398_v41  ;;  %v460_v59 = vor.u32 %v459_v47, %v455_v46  ;;  %v463_v60 = vshll.u32 %v292_v48, 16  ;;  %v477_v62 = vshll.u32 %v294_v53, 16  ;;  %v563_v42 = vld [vmem:[%s2661_s30 + $0x1c] sm:$0xf]  ;;  %v566_v47 = vld [vmem:[%s2661_s30 + $0x28] sm:$0xf] }
  0x30   : > { %505 = vrot.lane.b32.xlu1 %v394_v22, %s2584_s5  ;;  %v450_v61 = vor.u32 %v449_v50, %v446_v49  ;;  %v481_v63 = vshrl.u32 %v294_v53, 16  ;;  %v436_v0 = vor.u32 %v435_v52, %v431_v43  ;;  %v439_v2 = vshll.u32 %v289_v55, 16  ;;  %v564_v49 = vld [vmem:[%s2661_s30 + $0x20] sm:$0x1] }
  0x31   : > { %503 = vrot.lane.b32.xlu0 %v384_v35, %s2584_s5  ;;  %501 = vrot.lane.b32.xlu2 %v370_v40, %s2584_s5  ;;  %v403_v54 = vrot.slane %v402_v51, 4  ;;  %v468_v3 = vshrl.u32 %v293_v56, 16  ;;  %v471_v4 = vshll.u32 %v293_v56, 16  ;;  %v461_v5 = vrot.slane %v460_v59, 4  ;;  %v559_v35 = vld [vmem:[%s2661_s30 + $0xc] sm:$0xe] }
  0x32   : > { %v465_v6 = vrot.slane %v463_v60, 5  ;;  %v451_v7 = vrot.slane %v450_v61, 4  ;;  %v479_v8 = vrot.slane %v477_v62, 5  ;;  %v483_v9 = vrot.slane %v481_v63, 4  ;;  %v562_v51 = vld [vmem:[%s2661_s30 + $0x18] sm:$0xe] }
  0x33   : > { %v408_v1 = vsel %vm2672_vm2, %v403_v54, %v407_v16  ;;  %v437_v11 = vrot.slane %v436_v0, 4  ;;  %v441_v12 = vrot.slane %v439_v2, 5  ;;  %v470_v13 = vrot.slane %v468_v3, 4  ;;  %v569_v56 = vld [vmem:[%s2661_s30 + $0x34] sm:$0xf] }
  0x34   : > { %v473_v14 = vrot.slane %v471_v4, 5  ;;  %v466_v15 = vsel %vm2672_vm2, %v461_v5, %v465_v6  ;;  %v456_v16 = vsel %vm2672_vm2, %v451_v7, %v455_v46  ;;  %v484_v19 = vor.u32 %v483_v9, %v479_v8  ;;  %v565_v46 = vld [vmem:[%s2661_s30 + $0x24] sm:$0xe]  ;;  %v570_v61 = vld [vmem:[%s2661_s30 + $0x38] sm:$0x1] }
  0x35   : > { %v487_v20 = vshll.u32 %v295_v10, 16  ;;  %v442_v21 = vsel %vm2672_vm2, %v437_v11, %v441_v12  ;;  %v2255_v23 = vrot.slane %v556_v17, 9  ;;  %v609_v24 = vrot.slane %v557_v18, 5  ;;  %v568_v62 = vld [vmem:[%s2661_s30 + $0x30] sm:$0xe] }
  0x36   : > { %v474_v22 = vor.u32 %v473_v14, %v470_v13  ;;  %v485_v27 = vrot.slane %v484_v19, 4  ;;  %v616_v32 = vrot.slane %v560_v29, 5  ;;  %v619_v40 = vrot.slane %v561_v34, 5  ;;  %v567_v0 = vld [vmem:[%s2661_s30 + $0x2c] sm:$0x1] }
  0x37   : > { %v489_v28 = vrot.slane %v487_v20, 5  ;;  %v610_v31 = vsel %vm2740_vm5, %v2255_v23, %v609_v24  ;;  %v2256_v41 = vrot.slane %v559_v35, 9  ;;  %v611_v43 = vrot.slane %v609_v24, 4  ;;  %v572_v4 = vld [vmem:[%s2661_s30 + $0x40] sm:$0xf] }
  0x38   : > { %511 = vrot.lane.b32.xlu1 %v432_v57, %s2584_s5  ;;  %v475_v30 = vrot.slane %v474_v22, 4  ;;  %v618_v39 = vrot.slane %v616_v32, 4  ;;  %v612_v44 = vrot.slane %v558_v38, 5  ;;  %v623_v48 = vrot.slane %v563_v42, 5  ;;  %v574_v9 = vld [vmem:[%s2661_s30 + $0x48] sm:$0xe] }
  0x39   : > { %509 = vrot.lane.b32.xlu0 %v418_v58, %s2584_s5  ;;  %507 = vrot.lane.b32.xlu2 %v408_v1, %s2584_s5  ;;  %v490_v33 = vsel %vm2672_vm2, %v485_v27, %v489_v28  ;;  %v617_v37 = vsel %vm2740_vm5, %v2256_v41, %v616_v32  ;;  %v2258_v52 = vrot.slane %v565_v46, 9  ;;  %v630_v53 = vrot.slane %v566_v47, 5  ;;  %v575_v10 = vld [vmem:[%s2661_s30 + $0x4c] sm:$0xf]  ;;  %v573_v12 = vld [vmem:[%s2661_s30 + $0x44] sm:$0x1] }
  0x3a   : > { %v480_v36 = vsel %vm2672_vm2, %v475_v30, %v479_v8  ;;  %v620_v45 = vsel %vm2740_vm5, %v618_v39, %v619_v40  ;;  %v613_v50 = vsel %vm2740_vm5, %v611_v43, %v612_v44  ;;  %v625_v54 = vrot.slane %v623_v48, 4  ;;  %v571_v14 = vld [vmem:[%s2661_s30 + $0x3c] sm:$0xe]  ;;  %v578_v19 = vld [vmem:[%s2661_s30 + $0x58] sm:$0xf] }
  0x3b   : > { %v626_v55 = vrot.slane %v564_v49, 5  ;;  %v2257_v57 = vrot.slane %v562_v51, 9  ;;  %v631_v58 = vsel %vm2740_vm5, %v2258_v52, %v630_v53  ;;  %v637_v59 = vrot.slane %v569_v56, 5  ;;  %v579_v24 = vld [vmem:[%s2661_s30 + $0x5c] sm:$0x1] }
  0x3c   : > { %v640_v2 = vrot.slane %v570_v61, 5  ;;  %v2259_v3 = vrot.slane %v568_v62, 9  ;;  %v632_v5 = vrot.slane %v630_v53, 4  ;;  %v633_v6 = vrot.slane %v567_v0, 5  ;;  %v577_v27 = vld [vmem:[%s2661_s30 + $0x54] sm:$0xe] }
  0x3d   : > { %v627_v60 = vsel %vm2740_vm5, %v625_v54, %v626_v55  ;;  %v624_v63 = vsel %vm2740_vm5, %v2257_v57, %v623_v48  ;;  %v639_v1 = vrot.slane %v637_v59, 4  ;;  %v644_v11 = vrot.slane %v572_v4, 5  ;;  %v576_v29 = vld [vmem:[%s2661_s30 + $0x50] sm:$0x1]  ;;  %v243_v39 = vld [vmem:[%s2661_s30 + $0x18] sm:$0xf] }
  0x3e   : > { %v638_v8 = vsel %vm2740_vm5, %v2259_v3, %v637_v59  ;;  %v634_v13 = vsel %vm2740_vm5, %v632_v5, %v633_v6  ;;  %v647_v18 = vrot.slane %v573_v12, 5  ;;  %v2260_v20 = vrot.slane %v571_v14, 9  ;;  %260 = vst.msk [vmem:[#allocation2 + $0x10] sm:$0xf] %vm255_vm6, %v243_v39  ;;  %v241_v40 = vld [vmem:[%s2661_s30 + $0xc] sm:$0xf] }
  0x3f   : > { %v641_v7 = vsel %vm2740_vm5, %v639_v1, %v640_v2  ;;  %v646_v17 = vrot.slane %v644_v11, 4  ;;  %v658_v22 = vrot.slane %v578_v19, 5  ;;  %v2262_v32 = vrot.slane %v577_v27, 9  ;;  %v239_v41 = vld [vmem:[%s2661_s30] sm:$0xf] }
  0x40   : > { %517 = vrot.lane.b32.xlu1 %v466_v15, %s2584_s5  ;;  %v2261_v15 = vrot.slane %v574_v9, 9  ;;  %v645_v28 = vsel %vm2740_vm5, %v2260_v20, %v644_v11  ;;  %v654_v34 = vrot.slane %v576_v29, 5  ;;  %258 = vst.msk [vmem:[#allocation2 + $0x8] sm:$0xf] %vm255_vm6, %v241_v40  ;;  %v2265_v42 = vld [vmem:[%s2661_s30 + $0x18] sm:$0xf] }
  0x41   : > { %515 = vrot.lane.b32.xlu0 %v456_v16, %s2584_s5  ;;  %513 = vrot.lane.b32.xlu2 %v442_v21, %s2584_s5  ;;  %v651_v16 = vrot.slane %v575_v10, 5  ;;  %v648_v23 = vsel %vm2740_vm5, %v646_v17, %v647_v18  ;;  %v660_v30 = vrot.slane %v658_v22, 4  ;;  %256 = vst.msk [vmem:[#allocation2] sm:$0xf] %vm255_vm6, %v239_v41  ;;  %v2264_v43 = vld [vmem:[%s2661_s30 + $0x10] sm:$0xf] }
  0x42   : > { %v2263_v44 = vld [vmem:[%s2661_s30 + $0xc] sm:$0xf]  ;;  %v240_v46 = vld [vmem:[%s2661_s30 + $0x4] sm:$0xf]  ;;  %v2268_v47 = vld [vmem:[%s2661_s30 + $0x28] sm:$0xf] }
  0x43   : > { %v652_v21 = vsel %vm2740_vm5, %v2261_v15, %v651_v16  ;;  %257 = vst.msk [vmem:[#allocation2 + $0x4] sm:$0xf] %vm255_vm6, %v240_v46  ;;  %v2267_v48 = vld [vmem:[%s2661_s30 + $0x24] sm:$0xf]  ;;  %v2266_v49 = vld [vmem:[%s2661_s30 + $0x1c] sm:$0xf] }
  0x44   : > { %v246_v51 = vld [vmem:[%s2661_s30 + $0x28] sm:$0xf]  ;;  %v245_v52 = vld [vmem:[%s2661_s30 + $0x24] sm:$0xf]  ;;  %v2271_v54 = vld [vmem:[%s2661_s30 + $0x3c] sm:$0xf] }
  0x45   : > { %263 = vst.msk [vmem:[#allocation2 + $0x1c] sm:$0xf] %vm255_vm6, %v246_v51  ;;  %v2270_v55 = vld [vmem:[%s2661_s30 + $0x34] sm:$0xf]  ;;  %v2269_v56 = vld [vmem:[%s2661_s30 + $0x30] sm:$0xf] }
  0x46   : > { %262 = vst.msk [vmem:[#allocation2 + $0x18] sm:$0xf] %vm255_vm6, %v245_v52  ;;  %v2280_v57 = vld [vmem:[%s2661_s30 + $0x10] sm:$0xf]  ;;  %v250_v59 = vld [vmem:[%s2661_s30 + $0x40] sm:$0xf] }
  0x47   : > { %267 = vst.msk [vmem:[#allocation2 + $0x2c] sm:$0xf] %vm255_vm6, %v250_v59  ;;  %v248_v61 = vld [vmem:[%s2661_s30 + $0x34] sm:$0xf]  ;;  %v864_v0 = vshrl.u32 %v2280_v57, 16 }
  0x48   : > { %663 = vrot.lane.b32.xlu1 %v610_v31, %s2585_s6  ;;  %v661_v31 = vrot.slane %v579_v24, 5  ;;  %265 = vst.msk [vmem:[#allocation2 + $0x24] sm:$0xf] %vm255_vm6, %v248_v61  ;;  %v2274_v3 = vld [vmem:[%s2661_s30 + $0x4c] sm:$0xf] }
  0x49   : > { %521 = vrot.lane.b32.xlu0 %v490_v33, %s2584_s5  ;;  %519 = vrot.lane.b32.xlu2 %v480_v36, %s2584_s5  ;;  %v653_v33 = vrot.slane %v651_v16, 4  ;;  %v659_v36 = vsel %vm2740_vm5, %v2262_v32, %v658_v22  ;;  %v2273_v4 = vld [vmem:[%s2661_s30 + $0x48] sm:$0xf]  ;;  %v2272_v5 = vld [vmem:[%s2661_s30 + $0x40] sm:$0xf] }
  0x4a   : > { %v662_v35 = vsel %vm2740_vm5, %v660_v30, %v661_v31  ;;  %v2281_v10 = vld [vmem:[%s2661_s30 + $0x14] sm:$0x1]  ;;  %v2283_v14 = vld [vmem:[%s2661_s30 + $0x1c] sm:$0xf]  ;;  %v2277_v16 = vld [vmem:[%s2661_s30 + $0x60] sm:$0xf] }
  0x4b   : > { %v655_v38 = vsel %vm2740_vm5, %v653_v33, %v654_v34  ;;  %v253_v11 = vld [vmem:[%s2661_s30 + $0x54] sm:$0xf]  ;;  %v252_v17 = vld [vmem:[%s2661_s30 + $0x4c] sm:$0xf]  ;;  %v2282_v18 = vld [vmem:[%s2661_s30 + $0x18] sm:$0xf] }
  0x4c   : > { %270 = vst.msk [vmem:[#allocation2 + $0x38] sm:$0xf] %vm255_vm6, %v253_v11  ;;  %v870_v20 = vshll.u32 %v2281_v10, 16  ;;  %v2276_v24 = vld [vmem:[%s2661_s30 + $0x58] sm:$0xf]  ;;  %v884_v29 = vshll.u32 %v2283_v14, 16 }
  0x4d   : > { %v888_v30 = vshrl.u32 %v2283_v14, 16  ;;  %269 = vst.msk [vmem:[#allocation2 + $0x34] sm:$0xf] %vm255_vm6, %v252_v17  ;;  %v875_v31 = vshrl.u32 %v2282_v18, 16  ;;  %v878_v32 = vshll.u32 %v2282_v18, 16 }
  0x4e   : > { %v2275_v33 = vld [vmem:[%s2661_s30 + $0x54] sm:$0xf]  ;;  %v2288_v41 = vld [vmem:[%s2661_s30 + $0x30] sm:$0xf]  ;;  %v2294_v11 = vld [vmem:[%s2661_s30 + $0x48] sm:$0xf] }
  0x4f   : > { %v2289_v40 = vld [vmem:[%s2661_s30 + $0x34] sm:$0xf]  ;;  %v880_v46 = vrot.slane %v878_v32, 5  ;;  %v2292_v14 = vld [vmem:[%s2661_s30 + $0x40] sm:$0xf] }
  0x50   : > { %669 = vrot.lane.b32.xlu1 %v620_v45, %s2585_s6  ;;  %v244_v45 = vld [vmem:[%s2661_s30 + $0x1c] sm:$0xf]  ;;  %v932_v51 = vshll.u32 %v2289_v40, 16  ;;  %v936_v52 = vshrl.u32 %v2289_v40, 16 }
  0x51   : > { %667 = vrot.lane.b32.xlu0 %v617_v37, %s2585_s6  ;;  %665 = vrot.lane.b32.xlu2 %v613_v50, %s2585_s6  ;;  %261 = vst.msk [vmem:[#allocation2 + $0x14] sm:$0xf] %vm255_vm6, %v244_v45  ;;  %v242_v37 = vld [vmem:[%s2661_s30 + $0x10] sm:$0xf]  ;;  %v890_v45 = vrot.slane %v888_v30, 4 }
  0x52   : > { %259 = vst.msk [vmem:[#allocation2 + $0xc] sm:$0xf] %vm255_vm6, %v242_v37  ;;  %v247_v50 = vld [vmem:[%s2661_s30 + $0x30] sm:$0xf]  ;;  %v877_v37 = vrot.slane %v875_v31, 4 }
  0x53   : > { %264 = vst.msk [vmem:[#allocation2 + $0x20] sm:$0xf] %vm255_vm6, %v247_v50 }
  0x54   : > { %v881_v61 = vor.u32 %v880_v46, %v877_v37 }
  0x56   : > { %v882_v10 = vrot.slane %v881_v61, 4 }
  0x58   : > { %675 = vrot.lane.b32.xlu1 %v631_v58, %s2585_s6  ;;  %v2279_v58 = vld [vmem:[%s2661_s30 + $0xc] sm:$0xf] }
  0x59   : > { %673 = vrot.lane.b32.xlu0 %v627_v60, %s2585_s6  ;;  %671 = vrot.lane.b32.xlu2 %v624_v63, %s2585_s6  ;;  %v249_v60 = vld [vmem:[%s2661_s30 + $0x3c] sm:$0xf]  ;;  %v860_v63 = vshll.u32 %v2280_v57, 16  ;;  %v851_v1 = vshrl.u32 %v2279_v58, 16  ;;  %v854_v2 = vshll.u32 %v2279_v58, 16 }
  0x5a   : > { %266 = vst.msk [vmem:[#allocation2 + $0x28] sm:$0xf] %vm255_vm6, %v249_v60 }
  0x5b   : > { %v2871_v6 = vrot.slane %v860_v63, 5  ;;  %v856_v9 = vrot.slane %v854_v2, 5  ;;  %v2278_v63 = vld [vmem:[%s2661_s30 + $0x64] sm:$0xf]  ;;  %v938_v2 = vrot.slane %v936_v52, 4 }
  0x60   : > { %681 = vrot.lane.b32.xlu1 %v641_v7, %s2585_s6  ;;  %v866_v7 = vrot.slane %v864_v0, 4  ;;  %v2290_v0 = vld [vmem:[%s2661_s30 + $0x38] sm:$0x1] }
  0x61   : > { %679 = vrot.lane.b32.xlu0 %v638_v8, %s2585_s6  ;;  %677 = vrot.lane.b32.xlu2 %v634_v13, %s2585_s6  ;;  %v853_v8 = vrot.slane %v851_v1, 4  ;;  %v2285_v13 = vld [vmem:[%s2661_s30 + $0x24] sm:$0xf]  ;;  %v2915_v1 = vrot.slane %v932_v51, 5  ;;  %v2297_v51 = vld [vmem:[%s2661_s30 + $0x54] sm:$0xf] }
  0x62   : > { %v867_v19 = vor.u32 %v866_v7, %v2871_v6  ;;  %v899_v27 = vshrl.u32 %v2285_v13, 16 }
  0x64   : > { %v868_v34 = vrot.slane %v867_v19, 4  ;;  %v2287_v19 = vld [vmem:[%s2661_s30 + $0x2c] sm:$0x1] }
  0x65   : > { %v918_v31 = vshll.u32 %v2287_v19, 16 }
  0x68   : > { %687 = vrot.lane.b32.xlu1 %v652_v21, %s2585_s6  ;;  %v857_v21 = vor.u32 %v856_v9, %v853_v8 }
  0x69   : > { %685 = vrot.lane.b32.xlu0 %v648_v23, %s2585_s6  ;;  %683 = vrot.lane.b32.xlu2 %v645_v28, %s2585_s6  ;;  %v251_v23 = vld [vmem:[%s2661_s30 + $0x48] sm:$0xf]  ;;  %v902_v28 = vshll.u32 %v2285_v13, 16  ;;  %v942_v13 = vshll.u32 %v2290_v0, 16 }
  0x6a   : > { %268 = vst.msk [vmem:[#allocation2 + $0x30] sm:$0xf] %vm255_vm6, %v251_v23  ;;  %v974_v23 = vshll.u32 %v2294_v11, 16 }
  0x6b   : > { %v904_v39 = vrot.slane %v902_v28, 5  ;;  %v956_v28 = vshll.u32 %v2292_v14, 16 }
  0x6c   : > { %v976_v40 = vrot.slane %v974_v23, 5 }
  0x70   : > { %693 = vrot.lane.b32.xlu1 %v662_v35, %s2585_s6  ;;  %v872_v35 = vrot.slane %v870_v20, 5  ;;  %v2291_v20 = vld [vmem:[%s2661_s30 + $0x3c] sm:$0xf] }
  0x71   : > { %691 = vrot.lane.b32.xlu0 %v659_v36, %s2585_s6  ;;  %689 = vrot.lane.b32.xlu2 %v655_v38, %s2585_s6  ;;  %v858_v36 = vrot.slane %v857_v21, 4  ;;  %v901_v38 = vrot.slane %v899_v27, 4  ;;  %v947_v32 = vshrl.u32 %v2291_v20, 16 }
  0x73   : > { %v863_v58 = vsel %vm2672_vm2, %v858_v36, %v2871_v6 }
  0x78   : > { %765 = vrot.lane.b32.xlu1 %v2265_v42, %s2586_s7 }
  0x79   : > { %763 = vrot.lane.b32.xlu0 %v2264_v43, %s2586_s7  ;;  %761 = vrot.lane.b32.xlu2 %v2263_v44, %s2586_s7  ;;  %v2286_v43 = vld [vmem:[%s2661_s30 + $0x28] sm:$0xf]  ;;  %v2898_v44 = vrot.slane %v884_v29, 5  ;;  %v960_v29 = vshrl.u32 %v2292_v14, 16 }
  0x7a   : > { %v908_v57 = vshll.u32 %v2286_v43, 16 }
  0x7b   : > { %v891_v59 = vor.u32 %v890_v45, %v2898_v44  ;;  %v887_v27 = vsel %vm2672_vm2, %v882_v10, %v2898_v44  ;;  %v962_v44 = vrot.slane %v960_v29, 4  ;;  %v2298_v45 = vld [vmem:[%s2661_s30 + $0x58] sm:$0xf] }
  0x7c   : > { %v910_v6 = vrot.slane %v908_v57, 5 }
  0x7d   : > { %v892_v8 = vrot.slane %v891_v59, 4  ;;  %v1008_v59 = vshrl.u32 %v2298_v45, 16 }
  0x80   : > { %771 = vrot.lane.b32.xlu1 %v2268_v47, %s2586_s7 }
  0x81   : > { %769 = vrot.lane.b32.xlu0 %v2267_v48, %s2586_s7  ;;  %767 = vrot.lane.b32.xlu2 %v2266_v49, %s2586_s7  ;;  %v2284_v48 = vld [vmem:[%s2661_s30 + $0x20] sm:$0x1]  ;;  %v254_v49 = vld [vmem:[%s2661_s30 + $0x58] sm:$0xf] }
  0x82   : > { %v894_v60 = vshll.u32 %v2284_v48, 16  ;;  %271 = vst.msk [vmem:[#allocation2 + $0x3c] sm:$0xf] %vm255_vm6, %v254_v49  ;;  %v949_v48 = vrot.slane %v947_v32, 4 }
  0x83   : > { %v500_v53 = vpop.permute.xlu2 %499 }
  0x84   : > { %544 = vst.msk [vmem:[#allocation2 + $0x10] sm:$0xf] %vm539_vm7, %v500_v53  ;;  %v923_v53 = vshrl.u32 %v2288_v41, 16  ;;  %v896_v9 = vrot.slane %v894_v60, 5 }
  0x88   : > { %777 = vrot.lane.b32.xlu1 %v2271_v54, %s2586_s7  ;;  %v926_v54 = vshll.u32 %v2288_v41, 16  ;;  %v2293_v41 = vld [vmem:[%s2661_s30 + $0x44] sm:$0x1] }
  0x89   : > { %775 = vrot.lane.b32.xlu0 %v2270_v55, %s2586_s7  ;;  %773 = vrot.lane.b32.xlu2 %v2269_v56, %s2586_s7  ;;  %v873_v55 = vsel %vm2672_vm2, %v868_v34, %v872_v35  ;;  %v905_v56 = vor.u32 %v904_v39, %v901_v38  ;;  %v944_v35 = vrot.slane %v942_v13, 5  ;;  %v2937_v38 = vld [vmem:[%s2661_s30 + $0x4c] sm:$0xf]  ;;  %v966_v57 = vshll.u32 %v2293_v41, 16 }
  0x8b   : > { %v502_v62 = vpop.permute.xlu2 %501 }
  0x8c   : > { %545 = vst.msk [vmem:[#allocation2 + $0x14] sm:$0xf] %vm539_vm7, %v502_v62  ;;  %v912_v62 = vshrl.u32 %v2286_v43, 16  ;;  %v958_v43 = vrot.slane %v956_v28, 5  ;;  %v2322_v28 = vld [vmem:[%s2661_s30 + $0x58] sm:$0xf] }
  0x90   : > { %783 = vrot.lane.b32.xlu1 %v2274_v3, %s2586_s7  ;;  %v925_v3 = vrot.slane %v923_v53, 4 }
  0x91   : > { %781 = vrot.lane.b32.xlu0 %v2273_v4, %s2586_s7  ;;  %779 = vrot.lane.b32.xlu2 %v2272_v5, %s2586_s7  ;;  %v928_v4 = vrot.slane %v926_v54, 5  ;;  %v906_v5 = vrot.slane %v905_v56, 4  ;;  %v963_v56 = vor.u32 %v962_v44, %v958_v43 }
  0x92   : > { %v496_v12 = vpop.permute.xlu1 %495 }
  0x93   : > { %542 = vst.msk [vmem:[#allocation2 + $0x8] sm:$0xf] %vm539_vm7, %v496_v12  ;;  %v492_v15 = vpop.permute.xlu0 %491  ;;  %v508_v22 = vpop.permute.xlu2 %507  ;;  %v929_v17 = vor.u32 %v928_v4, %v925_v3  ;;  %v911_v21 = vsel %vm2672_vm2, %v906_v5, %v910_v6  ;;  %v964_v3 = vrot.slane %v963_v56, 4  ;;  %v968_v4 = vrot.slane %v966_v57, 5  ;;  %v2299_v5 = vld [vmem:[%s2661_s30 + $0x5c] sm:$0x1] }
  0x94   : > { %540 = vst.msk [vmem:[#allocation2] sm:$0xf] %vm539_vm7, %v492_v15  ;;  %v914_v15 = vrot.slane %v912_v62, 4  ;;  %v995_v62 = vshrl.u32 %v2297_v51, 16 }
  0x95   : > { %548 = vst.msk [vmem:[#allocation2 + $0x20] sm:$0xf] %vm539_vm7, %v508_v22  ;;  %v971_v22 = vshrl.u32 %v2294_v11, 16  ;;  %v930_v36 = vrot.slane %v929_v17, 4  ;;  %v969_v14 = vsel %vm2672_vm2, %v964_v3, %v968_v4  ;;  %v2369_v3 = vld [vmem:[%s2661_s30 + $0x60] sm:$0xf] }
  0x96   : > { %v915_v30 = vor.u32 %v914_v15, %v910_v6  ;;  %v997_v10 = vrot.slane %v995_v62, 4  ;;  %v2315_v15 = vld [vmem:[%s2661_s30 + $0x3c] sm:$0xe]  ;;  %v2347_v4 = vld [vmem:[%s2661_s30 + $0x60] sm:$0xf] }
  0x97   : > { %v973_v39 = vrot.slane %v971_v22, 4  ;;  %v935_v53 = vsel %vm2672_vm2, %v930_v36, %v2915_v1  ;;  %v2321_v36 = vld [vmem:[%s2661_s30 + $0x54] sm:$0xe] }
  0x98   : > { %789 = vrot.lane.b32.xlu1 %v2277_v16, %s2586_s7  ;;  %v939_v16 = vor.u32 %v938_v2, %v2915_v1  ;;  %v916_v46 = vrot.slane %v915_v30, 4  ;;  %v2333_v44 = vrot.slane %v2321_v36, 9 }
  0x99   : > { %787 = vrot.lane.b32.xlu0 %v2276_v24, %s2586_s7  ;;  %785 = vrot.lane.b32.xlu2 %v2275_v33, %s2586_s7  ;;  %v897_v24 = vsel %vm2672_vm2, %v892_v8, %v896_v9  ;;  %v950_v33 = vshll.u32 %v2291_v20, 16  ;;  %v977_v54 = vor.u32 %v976_v40, %v973_v39  ;;  %v2317_v40 = vld [vmem:[%s2661_s30 + $0x44] sm:$0x1] }
  0x9a   : > { %v498_v42 = vpop.permute.xlu1 %497  ;;  %v940_v34 = vrot.slane %v939_v16, 4  ;;  %v2316_v16 = vld [vmem:[%s2661_s30 + $0x40] sm:$0xf] }
  0x9b   : > { %543 = vst.msk [vmem:[#allocation2 + $0xc] sm:$0xf] %vm539_vm7, %v498_v42  ;;  %v494_v47 = vpop.permute.xlu0 %493  ;;  %v514_v50 = vpop.permute.xlu2 %513  ;;  %v952_v49 = vrot.slane %v950_v33, 5  ;;  %v978_v0 = vrot.slane %v977_v54, 4  ;;  %v1185_v22 = vrot.slane %v2316_v16, 5  ;;  %v1199_v33 = vrot.slane %v2322_v28, 5 }
  0x9c   : > { %541 = vst.msk [vmem:[#allocation2 + $0x4] sm:$0xf] %vm539_vm7, %v494_v47  ;;  %v920_v47 = vrot.slane %v918_v31, 5  ;;  %v945_v52 = vsel %vm2672_vm2, %v940_v34, %v944_v35  ;;  %v2323_v35 = vld [vmem:[%s2661_s30 + $0x5c] sm:$0x1] }
  0x9d   : > { %551 = vst.msk [vmem:[#allocation2 + $0x2c] sm:$0xf] %vm539_vm7, %v514_v50  ;;  %v953_v61 = vor.u32 %v952_v49, %v949_v48  ;;  %v1201_v41 = vrot.slane %v1199_v33, 4  ;;  %v2363_v48 = vld [vmem:[%s2661_s30 + $0x48] sm:$0xf] }
  0x9e   : > { %v921_v60 = vsel %vm2672_vm2, %v916_v46, %v920_v47  ;;  %v1187_v46 = vrot.slane %v1185_v22, 4  ;;  %v1188_v47 = vrot.slane %v2317_v40, 5  ;;  %v1495_v54 = vshrl.u32 %v2363_v48, 16 }
  0x9f   : > { %v954_v9 = vrot.slane %v953_v61, 4 }
  0xa0   : > { %1044 = vrot.lane.b32.xlu1 %v873_v55, %s2587_s8  ;;  %v980_v55 = vshll.u32 %v2937_v38, 16  ;;  %v1189_v56 = vsel %vm2740_vm5, %v1187_v46, %v1188_v47  ;;  %v1497_v61 = vrot.slane %v1495_v54, 4 }
  0xa1   : > { %1042 = vrot.lane.b32.xlu0 %v863_v58, %s2587_s8  ;;  %791 = vrot.lane.b32.xlu2 %v2278_v63, %s2586_s7  ;;  %v1004_v58 = vshll.u32 %v2298_v45, 16  ;;  %v998_v63 = vshll.u32 %v2297_v51, 16  ;;  %v959_v19 = vsel %vm2672_vm2, %v954_v9, %v958_v43  ;;  %v2364_v45 = vld [vmem:[%s2661_s30 + $0x4c] sm:$0xf] }
  0xa2   : > { %v506_v7 = vpop.permute.xlu1 %505  ;;  %v2956_v1 = vrot.slane %v980_v55, 5  ;;  %v1504_v51 = vshll.u32 %v2364_v45, 16  ;;  %v1498_v55 = vshll.u32 %v2363_v48, 16  ;;  %v2395_v48 = vld [vmem:[%s2661_s30 + $0x68] sm:$0x1] }
  0xa3   : > { %547 = vst.msk [vmem:[#allocation2 + $0x1c] sm:$0xf] %vm539_vm7, %v506_v7  ;;  %v504_v12 = vpop.permute.xlu0 %503  ;;  %v520_v18 = vpop.permute.xlu2 %519  ;;  %v1006_v6 = vrot.slane %v1004_v58, 5  ;;  %v1010_v7 = vrot.slane %v1008_v59, 4  ;;  %v1000_v11 = vrot.slane %v998_v63, 5 }
  0xa4   : > { %546 = vst.msk [vmem:[#allocation2 + $0x18] sm:$0xf] %vm539_vm7, %v504_v12  ;;  %v983_v13 = vsel %vm2672_vm2, %v978_v0, %v2956_v1  ;;  %v1506_v57 = vrot.slane %v1504_v51, 5  ;;  %v1500_v62 = vrot.slane %v1498_v55, 5  ;;  %v2370_v0 = vld [vmem:[%s2661_s30 + $0x64] sm:$0xf] }
  0xa5   : > { %554 = vst.msk [vmem:[#allocation2 + $0x38] sm:$0xf] %vm539_vm7, %v520_v18  ;;  %v1011_v17 = vor.u32 %v1010_v7, %v1006_v6  ;;  %v1014_v18 = vshll.u32 %v2299_v5, 16  ;;  %v1001_v20 = vor.u32 %v1000_v11, %v997_v10  ;;  %v2344_v7 = vld [vmem:[%s2661_s30 + $0x4c] sm:$0xf]  ;;  %v1552_v9 = vshll.u32 %v2370_v0, 16 }
  0xa6   : > { %v1556_v10 = vshrl.u32 %v2370_v0, 16  ;;  %v2343_v11 = vld [vmem:[%s2661_s30 + $0x48] sm:$0xf]  ;;  %v2389_v51 = vld [vmem:[%s2661_s30 + $0x50] sm:$0x1] }
  0xa7   : > { %v1002_v30 = vrot.slane %v1001_v20, 4  ;;  %v2310_v0 = vld [vmem:[%s2661_s30 + $0x28] sm:$0xf] }
  0xa8   : > { %1050 = vrot.lane.b32.xlu1 %v911_v21, %s2587_s8  ;;  %v2331_v21 = vrot.slane %v2315_v15, 9 }
  0xa9   : > { %1048 = vrot.lane.b32.xlu0 %v897_v24, %s2587_s8  ;;  %1046 = vrot.lane.b32.xlu2 %v887_v27, %s2587_s8  ;;  %v1012_v24 = vrot.slane %v1011_v17, 4  ;;  %v1016_v27 = vrot.slane %v1014_v18, 5  ;;  %v1007_v39 = vsel %vm2672_vm2, %v1002_v30, %v1006_v6  ;;  %v1554_v18 = vrot.slane %v1552_v9, 5  ;;  %v2388_v30 = vld [vmem:[%s2661_s30 + $0x4c] sm:$0xf] }
  0xaa   : > { %v512_v42 = vpop.permute.xlu1 %511  ;;  %v1186_v32 = vsel %vm2740_vm5, %v2331_v21, %v1185_v22  ;;  %v2371_v21 = vld [vmem:[%s2661_s30 + $0x68] sm:$0x1]  ;;  %v1733_v36 = vrot.slane %v2388_v30, 5 }
  0xab   : > { %550 = vst.msk [vmem:[#allocation2 + $0x28] sm:$0xf] %vm539_vm7, %v512_v42  ;;  %v510_v37 = vpop.permute.xlu0 %509  ;;  %v666_v50 = vpop.permute.xlu2 %665  ;;  %v1017_v34 = vsel %vm2672_vm2, %v1012_v24, %v1016_v27  ;;  %v1202_v42 = vrot.slane %v2323_v35, 5 }
  0xac   : > { %549 = vst.msk [vmem:[#allocation2 + $0x24] sm:$0xf] %vm539_vm7, %v510_v37 }
  0xad   : > { %713 = vst.msk [vmem:[#allocation2 + $0x4] sm:$0xf] %vm711_vm8, %v666_v50  ;;  %v1203_v50 = vsel %vm2740_vm5, %v1201_v41, %v1202_v42  ;;  %v2394_v42 = vld [vmem:[%s2661_s30 + $0x64] sm:$0xf] }
  0xae   : > { %v1747_v46 = vrot.slane %v2394_v42, 5 }
  0xb0   : > { %1056 = vrot.lane.b32.xlu1 %v945_v52, %s2587_s8  ;;  %v1508_v52 = vshrl.u32 %v2364_v45, 16 }
  0xb1   : > { %1054 = vrot.lane.b32.xlu0 %v935_v53, %s2587_s8  ;;  %1052 = vrot.lane.b32.xlu2 %v921_v60, %s2587_s8  ;;  %v1200_v53 = vsel %vm2740_vm5, %v2333_v44, %v1199_v33  ;;  %v2365_v60 = vld [vmem:[%s2661_s30 + $0x50] sm:$0x1]  ;;  %v2348_v33 = vld [vmem:[%s2661_s30 + $0x64] sm:$0xf] }
  0xb2   : > { %v518_v2 = vpop.permute.xlu1 %517  ;;  %v1510_v58 = vrot.slane %v1508_v52, 4  ;;  %v1514_v6 = vshll.u32 %v2365_v60, 16  ;;  %v1749_v52 = vrot.slane %v1747_v46, 4 }
  0xb3   : > { %553 = vst.msk [vmem:[#allocation2 + $0x34] sm:$0xf] %vm539_vm7, %v518_v2  ;;  %v516_v8 = vpop.permute.xlu0 %515  ;;  %v672_v12 = vpop.permute.xlu2 %671 }
  0xb4   : > { %552 = vst.msk [vmem:[#allocation2 + $0x30] sm:$0xf] %vm539_vm7, %v516_v8  ;;  %v1511_v5 = vor.u32 %v1510_v58, %v1506_v57  ;;  %v1501_v8 = vor.u32 %v1500_v62, %v1497_v61  ;;  %v1516_v15 = vrot.slane %v1514_v6, 5  ;;  %v1735_v58 = vrot.slane %v1733_v36, 4 }
  0xb5   : > { %716 = vst.msk [vmem:[#allocation2 + $0x10] sm:$0xf] %vm711_vm8, %v672_v12  ;;  %v1543_v12 = vshrl.u32 %v2369_v3, 16 }
  0xb6   : > { %v1502_v17 = vrot.slane %v1501_v8, 4 }
  0xb7   : > { %v1545_v22 = vrot.slane %v1543_v12, 4 }
  0xb8   : > { %1062 = vrot.lane.b32.xlu1 %v983_v13, %s2587_s8  ;;  %v1546_v13 = vshll.u32 %v2369_v3, 16  ;;  %v1507_v28 = vsel %vm2672_vm2, %v1502_v17, %v1506_v57  ;;  %v2304_v57 = vld [vmem:[%s2661_s30 + $0x10] sm:$0xf]  ;;  %v2305_v3 = vld [vmem:[%s2661_s30 + $0x14] sm:$0x1] }
  0xb9   : > { %1060 = vrot.lane.b32.xlu0 %v969_v14, %s2587_s8  ;;  %1058 = vrot.lane.b32.xlu2 %v959_v19, %s2587_s8  ;;  %v1512_v14 = vrot.slane %v1511_v5, 4  ;;  %v1558_v19 = vrot.slane %v1556_v10, 4  ;;  %v2303_v5 = vld [vmem:[%s2661_s30 + $0xc] sm:$0xe]  ;;  %v1160_v10 = vrot.slane %v2305_v3, 5 }
  0xba   : > { %v664_v23 = vpop.permute.xlu1 %663 }
  0xbb   : > { %712 = vst.msk [vmem:[#allocation2] sm:$0xf] %vm711_vm8, %v664_v23  ;;  %v522_v29 = vpop.permute.xlu0 %521  ;;  %v678_v31 = vpop.permute.xlu2 %677  ;;  %v1548_v23 = vrot.slane %v1546_v13, 5  ;;  %v1517_v27 = vsel %vm2672_vm2, %v1512_v14, %v1516_v15  ;;  %v2327_v13 = vrot.slane %v2303_v5, 9  ;;  %v2300_v5 = vld [vmem:[%s2661_s30 + $0x60] sm:$0xf] }
  0xbc   : > { %555 = vst.msk [vmem:[#allocation2 + $0x3c] sm:$0xf] %vm539_vm7, %v522_v29  ;;  %v2387_v29 = vld [vmem:[%s2661_s30 + $0x48] sm:$0xe] }
  0xbd   : > { %719 = vst.msk [vmem:[#allocation2 + $0x1c] sm:$0xf] %vm711_vm8, %v678_v31  ;;  %v1559_v31 = vor.u32 %v1558_v19, %v1554_v18  ;;  %v2403_v35 = vrot.slane %v2387_v29, 9 }
  0xbf   : > { %v1560_v40 = vrot.slane %v1559_v31, 4  ;;  %v2357_v31 = vld [vmem:[%s2661_s30 + $0x30] sm:$0xf] }
  0xc0   : > { %1227 = vrot.lane.b32.xlu1 %v1186_v32, %s2588_s9  ;;  %v1562_v32 = vshll.u32 %v2371_v21, 16  ;;  %v1450_v42 = vshll.u32 %v2357_v31, 16 }
  0xc1   : > { %1068 = vrot.lane.b32.xlu0 %v1017_v34, %s2587_s8  ;;  %1066 = vrot.lane.b32.xlu2 %v1007_v39, %s2587_s8  ;;  %v1549_v34 = vor.u32 %v1548_v23, %v1545_v22 }
  0xc2   : > { %v670_v43 = vpop.permute.xlu1 %669  ;;  %v1564_v41 = vrot.slane %v1562_v32, 5  ;;  %v2336_v32 = vld [vmem:[%s2661_s30 + $0x1c] sm:$0xf] }
  0xc3   : > { %715 = vst.msk [vmem:[#allocation2 + $0xc] sm:$0xf] %vm711_vm8, %v670_v43  ;;  %v668_v37 = vpop.permute.xlu0 %667  ;;  %v684_v49 = vpop.permute.xlu2 %683  ;;  %v1550_v44 = vrot.slane %v1549_v34, 4 }
  0xc4   : > { %714 = vst.msk [vmem:[#allocation2 + $0x8] sm:$0xf] %vm711_vm8, %v668_v37  ;;  %v1734_v37 = vsel %vm2740_vm5, %v2403_v35, %v1733_v36  ;;  %v1565_v47 = vsel %vm2672_vm2, %v1560_v40, %v1564_v41  ;;  %v2335_v40 = vld [vmem:[%s2661_s30 + $0x18] sm:$0xf]  ;;  %v1447_v41 = vshrl.u32 %v2357_v31, 16 }
  0xc5   : > { %722 = vst.msk [vmem:[#allocation2 + $0x28] sm:$0xf] %vm711_vm8, %v684_v49  ;;  %v2393_v49 = vld [vmem:[%s2661_s30 + $0x60] sm:$0xe] }
  0xc6   : > { %v2405_v55 = vrot.slane %v2393_v49, 9  ;;  %v2359_v49 = vld [vmem:[%s2661_s30 + $0x38] sm:$0x1] }
  0xc8   : > { %1237 = vrot.lane.b32.xlu1 %v1203_v50, %s2588_s9  ;;  %v1555_v50 = vsel %vm2672_vm2, %v1550_v44, %v1554_v18  ;;  %v1748_v62 = vsel %vm2740_vm5, %v2405_v55, %v1747_v46  ;;  %v2353_v55 = vld [vmem:[%s2661_s30 + $0x20] sm:$0x1] }
  0xc9   : > { %1235 = vrot.lane.b32.xlu0 %v1200_v53, %s2588_s9  ;;  %1229 = vrot.lane.b32.xlu2 %v1189_v56, %s2588_s9  ;;  %v1750_v53 = vrot.slane %v2395_v48, 5 }
  0xca   : > { %v676_v59 = vpop.permute.xlu1 %675 }
  0xcb   : > { %718 = vst.msk [vmem:[#allocation2 + $0x18] sm:$0xf] %vm711_vm8, %v676_v59  ;;  %v674_v63 = vpop.permute.xlu0 %673  ;;  %v690_v2 = vpop.permute.xlu2 %689  ;;  %v1736_v59 = vrot.slane %v2389_v51, 5  ;;  %v1751_v61 = vsel %vm2740_vm5, %v1749_v52, %v1750_v53  ;;  %v1452_v51 = vrot.slane %v1450_v42, 5 }
  0xcc   : > { %717 = vst.msk [vmem:[#allocation2 + $0x14] sm:$0xf] %vm711_vm8, %v674_v63  ;;  %v2309_v63 = vld [vmem:[%s2661_s30 + $0x24] sm:$0xe] }
  0xcd   : > { %725 = vst.msk [vmem:[#allocation2 + $0x34] sm:$0xf] %vm711_vm8, %v690_v2  ;;  %v1157_v2 = vrot.slane %v2304_v57, 5  ;;  %v2329_v6 = vrot.slane %v2309_v63, 9  ;;  %v1418_v63 = vshll.u32 %v2353_v55, 16 }
  0xcf   : > { %v1159_v9 = vrot.slane %v1157_v2, 4  ;;  %v1158_v19 = vsel %vm2740_vm5, %v2327_v13, %v1157_v2  ;;  %v1022_v13 = vshll.u32 %v2300_v5, 16 }
  0xd0   : > { %1333 = vrot.lane.b32.xlu1 %v2347_v4, %s2589_s10  ;;  %v1737_v4 = vsel %vm2740_vm5, %v1735_v58, %v1736_v59  ;;  %v1466_v58 = vshll.u32 %v2359_v49, 16  ;;  %v2340_v59 = vld [vmem:[%s2661_s30 + $0x34] sm:$0xf] }
  0xd1   : > { %1327 = vrot.lane.b32.xlu0 %v2344_v7, %s2589_s10  ;;  %1325 = vrot.lane.b32.xlu2 %v2343_v11, %s2589_s10  ;;  %v1171_v7 = vrot.slane %v2310_v0, 5  ;;  %v2351_v11 = vld [vmem:[%s2661_s30 + $0x18] sm:$0xf]  ;;  %v1161_v18 = vsel %vm2740_vm5, %v1159_v9, %v1160_v10  ;;  %v1420_v9 = vrot.slane %v1418_v63, 5 }
  0xd2   : > { %v682_v16 = vpop.permute.xlu1 %681  ;;  %v1402_v17 = vshll.u32 %v2351_v11, 16  ;;  %v1468_v2 = vrot.slane %v1466_v58, 5 }
  0xd3   : > { %721 = vst.msk [vmem:[#allocation2 + $0x24] sm:$0xf] %vm711_vm8, %v682_v16  ;;  %v680_v20 = vpop.permute.xlu0 %679  ;;  %v762_v24 = vpop.permute.xlu2 %761  ;;  %v1172_v15 = vsel %vm2740_vm5, %v2329_v6, %v1171_v7  ;;  %v1399_v16 = vshrl.u32 %v2351_v11, 16  ;;  %v1173_v29 = vrot.slane %v1171_v7, 4  ;;  %v2376_v7 = vld [vmem:[%s2661_s30 + $0x1c] sm:$0xf] }
  0xd4   : > { %720 = vst.msk [vmem:[#allocation2 + $0x20] sm:$0xf] %vm711_vm8, %v680_v20  ;;  %v2311_v20 = vld [vmem:[%s2661_s30 + $0x2c] sm:$0x1]  ;;  %v1404_v22 = vrot.slane %v1402_v17, 5 }
  0xd5   : > { %810 = vst.msk [vmem:[#allocation2] sm:$0xf] %vm809_vm9, %v762_v24  ;;  %v1401_v21 = vrot.slane %v1399_v16, 4  ;;  %v2352_v24 = vld [vmem:[%s2661_s30 + $0x1c] sm:$0xf]  ;;  %v1174_v30 = vrot.slane %v2311_v20, 5 }
  0xd6   : > { %v1408_v35 = vshll.u32 %v2352_v24, 16  ;;  %v2381_v16 = vld [vmem:[%s2661_s30 + $0x30] sm:$0xe]  ;;  %v2382_v17 = vld [vmem:[%s2661_s30 + $0x34] sm:$0xf] }
  0xd7   : > { %v1405_v34 = vor.u32 %v1404_v22, %v1401_v21  ;;  %v1175_v44 = vsel %vm2740_vm5, %v1173_v29, %v1174_v30  ;;  %v2375_v21 = vld [vmem:[%s2661_s30 + $0x18] sm:$0xe]  ;;  %v2401_v22 = vrot.slane %v2381_v16, 9  ;;  %v2301_v30 = vld [vmem:[%s2661_s30 + $0x64] sm:$0xf] }
  0xd8   : > { %1608 = vrot.lane.b32.xlu1 %v1517_v27, %s2590_s11  ;;  %v2358_v27 = vld [vmem:[%s2661_s30 + $0x34] sm:$0xf]  ;;  %v2324_v16 = vld [vmem:[%s2661_s30 + $0x60] sm:$0xe] }
  0xd9   : > { %1606 = vrot.lane.b32.xlu0 %v1507_v28, %s2590_s11  ;;  %1335 = vrot.lane.b32.xlu2 %v2348_v33, %s2589_s10  ;;  %v1456_v36 = vshll.u32 %v2358_v27, 16 }
  0xda   : > { %v688_v39 = vpop.permute.xlu1 %687 }
  0xdb   : > { %724 = vst.msk [vmem:[#allocation2 + $0x30] sm:$0xf] %vm711_vm8, %v688_v39  ;;  %v686_v43 = vpop.permute.xlu0 %685  ;;  %v768_v45 = vpop.permute.xlu2 %767  ;;  %v1460_v39 = vshrl.u32 %v2358_v27, 16  ;;  %v1458_v46 = vrot.slane %v1456_v36, 5 }
  0xdc   : > { %723 = vst.msk [vmem:[#allocation2 + $0x2c] sm:$0xf] %vm711_vm8, %v686_v43  ;;  %v1412_v43 = vshrl.u32 %v2352_v24, 16  ;;  %v1024_v24 = vrot.slane %v1022_v13, 5 }
  0xdd   : > { %813 = vst.msk [vmem:[#allocation2 + $0xc] sm:$0xf] %vm809_vm9, %v768_v45  ;;  %v1406_v45 = vrot.slane %v1405_v34, 4  ;;  %v2399_v34 = vrot.slane %v2375_v21, 9 }
  0xde   : > { %v1414_v53 = vrot.slane %v1412_v43, 4 }
  0xe0   : > { %1775 = vrot.lane.b32.xlu1 %v1734_v37, %s2591_s12  ;;  %v1410_v37 = vrot.slane %v1408_v35, 5 }
  0xe1   : > { %1616 = vrot.lane.b32.xlu0 %v1565_v47, %s2590_s11  ;;  %1614 = vrot.lane.b32.xlu2 %v1555_v50, %s2590_s11  ;;  %v1462_v47 = vrot.slane %v1460_v39, 4  ;;  %v1449_v50 = vrot.slane %v1447_v41, 4 }
  0xe2   : > { %v694_v54 = vpop.permute.xlu1 %693 }
  0xe3   : > { %727 = vst.msk [vmem:[#allocation2 + $0x3c] sm:$0xf] %vm711_vm8, %v694_v54  ;;  %v692_v56 = vpop.permute.xlu0 %691  ;;  %v774_v60 = vpop.permute.xlu2 %773  ;;  %v1463_v57 = vor.u32 %v1462_v47, %v1458_v46 }
  0xe4   : > { %726 = vst.msk [vmem:[#allocation2 + $0x38] sm:$0xf] %vm711_vm8, %v692_v56  ;;  %v1411_v56 = vsel %vm2672_vm2, %v1406_v45, %v1410_v37 }
  0xe5   : > { %816 = vst.msk [vmem:[#allocation2 + $0x18] sm:$0xf] %vm809_vm9, %v774_v60  ;;  %v1453_v60 = vor.u32 %v1452_v51, %v1449_v50  ;;  %v1464_v0 = vrot.slane %v1463_v57, 4 }
  0xe7   : > { %v1469_v11 = vsel %vm2672_vm2, %v1464_v0, %v1468_v2 }
  0xe8   : > { %1785 = vrot.lane.b32.xlu1 %v1751_v61, %s2591_s12  ;;  %v2339_v61 = vld [vmem:[%s2661_s30 + $0x30] sm:$0xf] }
  0xe9   : > { %1783 = vrot.lane.b32.xlu0 %v1748_v62, %s2591_s12  ;;  %1777 = vrot.lane.b32.xlu2 %v1737_v4, %s2591_s12  ;;  %v1415_v62 = vor.u32 %v1414_v53, %v1410_v37  ;;  %v1454_v4 = vrot.slane %v1453_v60, 4  ;;  %v2383_v37 = vld [vmem:[%s2661_s30 + $0x38] sm:$0x1]  ;;  %v2320_v60 = vld [vmem:[%s2661_s30 + $0x50] sm:$0x1] }
  0xea   : > { %v766_v8 = vpop.permute.xlu1 %765  ;;  %v1722_v53 = vrot.slane %v2383_v37, 5 }
  0xeb   : > { %812 = vst.msk [vmem:[#allocation2 + $0x8] sm:$0xf] %vm809_vm9, %v766_v8  ;;  %v764_v12 = vpop.permute.xlu0 %763  ;;  %v780_v14 = vpop.permute.xlu2 %779  ;;  %v1416_v8 = vrot.slane %v1415_v62, 4 }
  0xec   : > { %811 = vst.msk [vmem:[#allocation2 + $0x4] sm:$0xf] %vm809_vm9, %v764_v12  ;;  %v1019_v12 = vshrl.u32 %v2300_v5, 16 }
  0xed   : > { %819 = vst.msk [vmem:[#allocation2 + $0x24] sm:$0xf] %vm809_vm9, %v780_v14  ;;  %v984_v14 = vshrl.u32 %v2937_v38, 16  ;;  %v1421_v20 = vsel %vm2672_vm2, %v1416_v8, %v1420_v9 }
  0xee   : > { %v1021_v38 = vrot.slane %v1019_v12, 4 }
  0xef   : > { %v986_v31 = vrot.slane %v984_v14, 4  ;;  %v2326_v14 = vld [vmem:[%s2661_s30 + $0x68] sm:$0x1] }
  0xf0   : > { %1219 = vrot.lane.b32.xlu1 %v1172_v15, %s2588_s9  ;;  %v1459_v15 = vsel %vm2672_vm2, %v1454_v4, %v1458_v46  ;;  %v1025_v39 = vor.u32 %v1024_v24, %v1021_v38  ;;  %v2366_v24 = vld [vmem:[%s2661_s30 + $0x54] sm:$0xf] }
  0xf1   : > { %1213 = vrot.lane.b32.xlu0 %v1161_v18, %s2588_s9  ;;  %1211 = vrot.lane.b32.xlu2 %v1158_v19, %s2588_s9  ;;  %v1705_v18 = vrot.slane %v2376_v7, 5  ;;  %v2377_v19 = vld [vmem:[%s2661_s30 + $0x20] sm:$0x1]  ;;  %v987_v42 = vor.u32 %v986_v31, %v2956_v1  ;;  %v2319_v1 = vld [vmem:[%s2661_s30 + $0x4c] sm:$0xf] }
  0xf2   : > { %v772_v23 = vpop.permute.xlu1 %771  ;;  %v1708_v29 = vrot.slane %v2377_v19, 5  ;;  %v1026_v46 = vrot.slane %v1025_v39, 4  ;;  %v1192_v58 = vrot.slane %v2319_v1, 5  ;;  %v2325_v7 = vld [vmem:[%s2661_s30 + $0x64] sm:$0xf]  ;;  %v1209_v19 = vrot.slane %v2326_v14, 5 }
  0xf3   : > { %815 = vst.msk [vmem:[#allocation2 + $0x14] sm:$0xf] %vm809_vm9, %v772_v23  ;;  %v770_v28 = vpop.permute.xlu0 %769  ;;  %v786_v33 = vpop.permute.xlu2 %785  ;;  %v1719_v23 = vrot.slane %v2382_v17, 5  ;;  %v1706_v45 = vsel %vm2740_vm5, %v2399_v34, %v1705_v18  ;;  %v988_v49 = vrot.slane %v987_v42, 4  ;;  %v1206_v13 = vrot.slane %v2325_v7, 5 }
  0xf4   : > { %814 = vst.msk [vmem:[#allocation2 + $0x10] sm:$0xf] %vm809_vm9, %v770_v28  ;;  %v1707_v28 = vrot.slane %v1705_v18, 4  ;;  %v1194_v2 = vrot.slane %v1192_v58, 4  ;;  %v1519_v34 = vshrl.u32 %v2366_v24, 16 }
  0xf5   : > { %822 = vst.msk [vmem:[#allocation2 + $0x30] sm:$0xf] %vm809_vm9, %v786_v33  ;;  %v2296_v33 = vld [vmem:[%s2661_s30 + $0x50] sm:$0x1]  ;;  %v1720_v36 = vsel %vm2740_vm5, %v2401_v22, %v1719_v23  ;;  %v1208_v18 = vrot.slane %v1206_v13, 4  ;;  %v2334_v22 = vrot.slane %v2324_v16, 9 }
  0xf6   : > { %v1709_v41 = vsel %vm2740_vm5, %v1707_v28, %v1708_v29  ;;  %v990_v43 = vshll.u32 %v2296_v33, 16  ;;  %v1521_v37 = vrot.slane %v1519_v34, 4  ;;  %v2349_v1 = vld [vmem:[%s2661_s30 + $0x6c] sm:$0xf]  ;;  %v2374_v7 = vld [vmem:[%s2661_s30 + $0x74] sm:$0x1] }
  0xf7   : > { %v1207_v33 = vsel %vm2740_vm5, %v2334_v22, %v1206_v13  ;;  %v2390_v13 = vld [vmem:[%s2661_s30 + $0x54] sm:$0xe]  ;;  %v1586_v16 = vshll.u32 %v2374_v7, 16 }
  0xf8   : > { %1311 = vrot.lane.b32.xlu1 %v2336_v32, %s2589_s10  ;;  %v992_v50 = vrot.slane %v990_v43, 5 }
  0xf9   : > { %1309 = vrot.lane.b32.xlu0 %v2335_v40, %s2589_s10  ;;  %1221 = vrot.lane.b32.xlu2 %v1175_v44, %s2588_s9  ;;  %v1028_v40 = vshll.u32 %v2301_v30, 16  ;;  %v1032_v44 = vshrl.u32 %v2301_v30, 16  ;;  %v1210_v30 = vsel %vm2740_vm5, %v1208_v18, %v1209_v19 }
  0xfa   : > { %v778_v48 = vpop.permute.xlu1 %777 }
  0xfb   : > { %818 = vst.msk [vmem:[#allocation2 + $0x20] sm:$0xf] %vm809_vm9, %v778_v48  ;;  %v776_v52 = vpop.permute.xlu0 %775  ;;  %v792_v54 = vpop.permute.xlu2 %791  ;;  %v1030_v47 = vrot.slane %v1028_v40, 5 }
  0xfc   : > { %817 = vst.msk [vmem:[#allocation2 + $0x1c] sm:$0xf] %vm809_vm9, %v776_v52  ;;  %v1721_v52 = vrot.slane %v1719_v23, 4  ;;  %v2367_v23 = vld [vmem:[%s2661_s30 + $0x58] sm:$0xf] }
  0xfd   : > { %825 = vst.msk [vmem:[#allocation2 + $0x3c] sm:$0xf] %vm809_vm9, %v792_v54  ;;  %v1034_v54 = vrot.slane %v1032_v44, 4  ;;  %v1031_v57 = vsel %vm2672_vm2, %v1026_v46, %v1030_v47  ;;  %v1528_v31 = vshll.u32 %v2367_v23, 16 }
  0xfe   : > { %v1723_v62 = vsel %vm2740_vm5, %v1721_v52, %v1722_v53  ;;  %v1844_v53 = vld [vmem:[%s3532_s1 + $0x10] sm:$0x3] }
  0xff   : > { %v1035_v63 = vor.u32 %v1034_v54, %v1030_v47  ;;  %v3183_v42 = vrot.slane %v1528_v31, 5  ;;  %v2307_v31 = vld [vmem:[%s2661_s30 + $0x1c] sm:$0xf] }
 0x100   : > { %1590 = vrot.lane.b32.xlu1 %v1411_v56, %s2590_s11  ;;  %v2302_v56 = vld [vmem:[%s2661_s30 + $0x68] sm:$0x1] }
 0x101   : > { %1319 = vrot.lane.b32.xlu0 %v2340_v59, %s2589_s10  ;;  %1317 = vrot.lane.b32.xlu2 %v2339_v61, %s2589_s10  ;;  %v993_v59 = vsel %vm2672_vm2, %v988_v49, %v992_v50  ;;  %v2318_v61 = vld [vmem:[%s2661_s30 + $0x48] sm:$0xe]  ;;  %v1038_v0 = vshll.u32 %v2302_v56, 16  ;;  %v1036_v8 = vrot.slane %v1035_v63, 4 }
 0x102   : > { %v784_v3 = vpop.permute.xlu1 %783  ;;  %v2332_v5 = vrot.slane %v2318_v61, 9 }
 0x103   : > { %821 = vst.msk [vmem:[#allocation2 + $0x2c] sm:$0xf] %vm809_vm9, %v784_v3  ;;  %v782_v6 = vpop.permute.xlu0 %781  ;;  %v1047_v10 = vpop.permute.xlu2 %1046  ;;  %v1195_v3 = vrot.slane %v2320_v60, 5  ;;  %v1040_v9 = vrot.slane %v1038_v0, 5  ;;  %v2391_v0 = vld [vmem:[%s2661_s30 + $0x58] sm:$0xf] }
 0x104   : > { %820 = vst.msk [vmem:[#allocation2 + $0x28] sm:$0xf] %vm809_vm9, %v782_v6  ;;  %v1193_v12 = vsel %vm2740_vm5, %v2332_v5, %v1192_v58 }
 0x105   : > { %1093 = vst.msk [vmem:[#allocation2 + $0x8] sm:$0xf] %vm1090_vm10, %v1047_v10 }
 0x108   : > { %1600 = vrot.lane.b32.xlu1 %v1469_v11, %s2590_s11  ;;  %v1196_v11 = vsel %vm2740_vm5, %v1194_v2, %v1195_v3 }
 0x109   : > { %1598 = vrot.lane.b32.xlu0 %v1459_v15, %s2590_s11  ;;  %1592 = vrot.lane.b32.xlu2 %v1421_v20, %s2590_s11  ;;  %v1041_v15 = vsel %vm2672_vm2, %v1036_v8, %v1040_v9  ;;  %v2372_v20 = vld [vmem:[%s2661_s30 + $0x6c] sm:$0xf] }
 0x10a   : > { %v790_v27 = vpop.permute.xlu1 %789  ;;  %v1567_v28 = vshrl.u32 %v2372_v20, 16  ;;  %v1570_v29 = vshll.u32 %v2372_v20, 16  ;;  %v2482_v8 = vld [vmem:[%s3532_s1 + $0x8] sm:$0xff] }
 0x10b   : > { %824 = vst.msk [vmem:[#allocation2 + $0x38] sm:$0xf] %vm809_vm9, %v790_v27  ;;  %v788_v32 = vpop.permute.xlu0 %787  ;;  %v1053_v35 = vpop.permute.xlu2 %1052  ;;  %v2345_v27 = vld [vmem:[%s2661_s30 + $0x54] sm:$0xf] }
 0x10c   : > { %823 = vst.msk [vmem:[#allocation2 + $0x34] sm:$0xf] %vm809_vm9, %v788_v32  ;;  %v1532_v32 = vshrl.u32 %v2367_v23, 16  ;;  %v1572_v39 = vrot.slane %v1570_v29, 5  ;;  %v2397_v23 = vld [vmem:[%s2661_s30 + $0x70] sm:$0xf] }
 0x10d   : > { %1096 = vst.msk [vmem:[#allocation2 + $0x14] sm:$0xf] %vm1090_vm10, %v1053_v35  ;;  %v1522_v35 = vshll.u32 %v2366_v24, 16  ;;  %v1588_v24 = vrot.slane %v1586_v16, 5  ;;  %v2341_v16 = vld [vmem:[%s2661_s30 + $0x3c] sm:$0xf] }
 0x10e   : > { %v1534_v43 = vrot.slane %v1532_v32, 4  ;;  %v1754_v32 = vrot.slane %v2397_v23, 5  ;;  %v2337_v23 = vld [vmem:[%s2661_s30 + $0x24] sm:$0xf] }
 0x10f   : > { %v1524_v46 = vrot.slane %v1522_v35, 5  ;;  %v2396_v35 = vld [vmem:[%s2661_s30 + $0x6c] sm:$0xe] }
 0x110   : > { %1767 = vrot.lane.b32.xlu1 %v1720_v36, %s2591_s12  ;;  %v1569_v36 = vrot.slane %v1567_v28, 4 }
 0x111   : > { %1761 = vrot.lane.b32.xlu0 %v1709_v41, %s2591_s12  ;;  %1759 = vrot.lane.b32.xlu2 %v1706_v45, %s2591_s12  ;;  %v2373_v41 = vld [vmem:[%s2661_s30 + $0x70] sm:$0xf]  ;;  %v2368_v45 = vld [vmem:[%s2661_s30 + $0x5c] sm:$0x1]  ;;  %v1525_v56 = vor.u32 %v1524_v46, %v1521_v37 }
 0x112   : > { %v1045_v48 = vpop.permute.xlu1 %1044  ;;  %v1573_v49 = vor.u32 %v1572_v39, %v1569_v36  ;;  %v1576_v50 = vshll.u32 %v2373_v41, 16  ;;  %v1538_v52 = vshll.u32 %v2368_v45, 16  ;;  %v1580_v54 = vshrl.u32 %v2373_v41, 16 }
 0x113   : > { %1092 = vst.msk [vmem:[#allocation2 + $0x4] sm:$0xf] %vm1090_vm10, %v1045_v48  ;;  %v1043_v51 = vpop.permute.xlu0 %1042  ;;  %v1059_v55 = vpop.permute.xlu2 %1058  ;;  %v2350_v48 = vld [vmem:[%s2661_s30 + $0x70] sm:$0xf]  ;;  %v1526_v3 = vrot.slane %v1525_v56, 4  ;;  %v1164_v39 = vrot.slane %v2307_v31, 5 }
 0x114   : > { %1091 = vst.msk [vmem:[#allocation2] sm:$0xf] %vm1090_vm10, %v1043_v51  ;;  %v1535_v51 = vor.u32 %v1534_v43, %v3183_v42  ;;  %v1574_v58 = vrot.slane %v1573_v49, 4  ;;  %v1540_v63 = vrot.slane %v1538_v52, 5  ;;  %v1756_v41 = vrot.slane %v1754_v32, 4 }
 0x115   : > { %1099 = vst.msk [vmem:[#allocation2 + $0x20] sm:$0xf] %vm1090_vm10, %v1059_v55  ;;  %v2346_v55 = vld [vmem:[%s2661_s30 + $0x58] sm:$0xf]  ;;  %v1531_v14 = vsel %vm2672_vm2, %v1526_v3, %v3183_v42  ;;  %v2313_v43 = vld [vmem:[%s2661_s30 + $0x34] sm:$0xf] }
 0x116   : > { %v2406_v45 = vrot.slane %v2396_v35, 9  ;;  %v2314_v49 = vld [vmem:[%s2661_s30 + $0x38] sm:$0x1]  ;;  %v2355_v56 = vld [vmem:[%s2661_s30 + $0x28] sm:$0xf] }
 0x117   : > { %v2362_v35 = vld [vmem:[%s2661_s30 + $0x44] sm:$0x1] }
 0x118   : > { %1070 = vrot.lane.b32.xlu1 %v1031_v57, %s2587_s8  ;;  %v1898_v57 = vunpack.c.l.b16 %v1844_v53  ;;  %v1181_v53 = vrot.slane %v2314_v49, 5 }
 0x119   : > { %1064 = vrot.lane.b32.xlu0 %v993_v59, %s2587_s8  ;;  %1769 = vrot.lane.b32.xlu2 %v1723_v62, %s2591_s12  ;;  %v1578_v59 = vrot.slane %v1576_v50, 5  ;;  %v1536_v62 = vrot.slane %v1535_v51, 4  ;;  %v2312_v50 = vld [vmem:[%s2661_s30 + $0x30] sm:$0xe]  ;;  %v2308_v51 = vld [vmem:[%s2661_s30 + $0x20] sm:$0x1] }
 0x11a   : > { %v1051_v4 = vpop.permute.xlu1 %1050  ;;  %v1901_v60 = vpack.c.b16 %v1898_v57, %v1898_v57 }
 0x11b   : > { %1095 = vst.msk [vmem:[#allocation2 + $0x10] sm:$0xf] %vm1090_vm10, %v1051_v4  ;;  %v1049_v6 = vpop.permute.xlu0 %1048  ;;  %v1067_v10 = vpop.permute.xlu2 %1066  ;;  %v1582_v4 = vrot.slane %v1580_v54, 4  ;;  %v1579_v9 = vsel %vm2672_vm2, %v1574_v58, %v1578_v59  ;;  %v1166_v58 = vrot.slane %v1164_v39, 4 }
 0x11c   : > { %1094 = vst.msk [vmem:[#allocation2 + $0xc] sm:$0xf] %vm1090_vm10, %v1049_v6  ;;  %v1931_v5 = vsel %vm1929_vm12, %v1901_v60, 0  ;;  %v2354_v60 = vld [vmem:[%s2661_s30 + $0x24] sm:$0xf] }
 0x11d   : > { %1103 = vst.msk [vmem:[#allocation2 + $0x30] sm:$0xf] %vm1090_vm10, %v1067_v10  ;;  %2484 = vmatpush.bf16.msra.mxu2 %v1931_v5  ;;  %2485 = vmatpush.bf16.msra.mxu3 %v1931_v5  ;;  %v1740_v10 = vrot.slane %v2391_v0, 5  ;;  %v1436_v0 = vshrl.u32 %v2355_v56, 16  ;;  %v1423_v3 = vshrl.u32 %v2354_v60, 16 }
 0x11e   : > { %1938 = vmatpush.bf16.msra.mxu0 %v1931_v5  ;;  %2483 = vmatpush.bf16.msra.mxu1 %v1931_v5 }
 0x11f   : > { %v1742_v18 = vrot.slane %v1740_v10, 4  ;;  %v1438_v7 = vrot.slane %v1436_v0, 4 }
 0x120   : > { %1233 = vrot.lane.b32.xlu1 %v1196_v11, %s2588_s9  ;;  %v1541_v11 = vsel %vm2672_vm2, %v1536_v62, %v1540_v63  ;;  %v1432_v63 = vshll.u32 %v2355_v56, 16 }
 0x121   : > { %1231 = vrot.lane.b32.xlu0 %v1193_v12, %s2588_s9  ;;  %1072 = vrot.lane.b32.xlu2 %v1041_v15, %s2587_s8  ;;  %v2392_v12 = vld [vmem:[%s2661_s30 + $0x5c] sm:$0x1]  ;;  %v1583_v15 = vor.u32 %v1582_v4, %v1578_v59  ;;  %v1167_v59 = vrot.slane %v2308_v51, 5  ;;  %v1426_v4 = vshll.u32 %v2354_v60, 16  ;;  %v2386_v60 = vld [vmem:[%s2661_s30 + $0x44] sm:$0x1] }
 0x122   : > { %v1057_v17 = vpop.permute.xlu1 %1056  ;;  %2487 = vmatpush.bf16.msra.mxu2 %v2482_v8  ;;  %v1743_v19 = vrot.slane %v2392_v12, 5  ;;  %2488 = vmatpush.bf16.msra.mxu3 %v2482_v8  ;;  %s2592_s8 = smov 120  }
 0x123   : > { %1098 = vst.msk [vmem:[#allocation2 + $0x1c] sm:$0xf] %vm1090_vm10, %v1057_v17  ;;  %v1055_v21 = vpop.permute.xlu0 %1054  ;;  %v1230_v38 = vpop.permute.xlu2 %1229  ;;  %v2481_v17 = vld [vmem:[%s3532_s1] sm:$0xff]  ;;  %1939 = vmatpush.bf16.msra.mxu0 %v2482_v8  ;;  %2486 = vmatpush.bf16.msra.mxu1 %v2482_v8  ;;  %v1168_v5 = vsel %vm2740_vm5, %v1166_v58, %v1167_v59 }
 0x124   : > { %1097 = vst.msk [vmem:[#allocation2 + $0x18] sm:$0xf] %vm1090_vm10, %v1055_v21  ;;  %v2404_v21 = vrot.slane %v2390_v13, 9  ;;  %v1744_v28 = vsel %vm2740_vm5, %v1742_v18, %v1743_v19  ;;  %v2361_v13 = vld [vmem:[%s2661_s30 + $0x40] sm:$0xf] }
 0x125   : > { %v2338_v19 = vld [vmem:[%s2661_s30 + $0x28] sm:$0xf] }
 0x126   : > { %2490 = vmatpush.bf16.msra.mxu2 %v2481_v17  ;;  %2491 = vmatpush.bf16.msra.mxu3 %v2481_v17  ;;  %v1741_v29 = vsel %vm2740_vm5, %v2404_v21, %v1740_v10  ;;  %v1425_v10 = vrot.slane %v1423_v3, 4  ;;  %v1480_v21 = vshll.u32 %v2361_v13, 16 }
 0x127   : > { %1940 = vmatpush.bf16.msra.mxu0 %v2481_v17  ;;  %2489 = vmatpush.bf16.msra.mxu1 %v2481_v17 }
 0x128   : > { %1329 = vrot.lane.b32.xlu1 %v2345_v27, %s2589_s10 }
 0x129   : > { %1241 = vrot.lane.b32.xlu0 %v1210_v30, %s2588_s9  ;;  %1239 = vrot.lane.b32.xlu2 %v1207_v33, %s2588_s9  ;;  %v2306_v30 = vld [vmem:[%s2661_s30 + $0x18] sm:$0xe]  ;;  %v2398_v33 = vld [vmem:[%s2661_s30 + $0x74] sm:$0x1] }
 0x12a   : > { %v1063_v40 = vpop.permute.xlu1 %1062  ;;  %v2328_v36 = vrot.slane %v2306_v30, 9  ;;  %v1757_v42 = vrot.slane %v2398_v33, 5 }
 0x12b   : > { %1101 = vst.msk [vmem:[#allocation2 + $0x28] sm:$0xf] %vm1090_vm10, %v1063_v40  ;;  %v1061_v44 = vpop.permute.xlu0 %1060  ;;  %v1326_v47 = vpop.permute.xlu2 %1325 }
 0x12c   : > { %1100 = vst.msk [vmem:[#allocation2 + $0x24] sm:$0xf] %vm1090_vm10, %v1061_v44  ;;  %v1165_v46 = vsel %vm2740_vm5, %v2328_v36, %v1164_v39 }
 0x12d   : > { %1269 = vst.msk [vmem:[#allocation2 + $0x24] sm:$0xf] %vm1259_vm11, %v1230_v38  ;;  %v1584_v38 = vrot.slane %v1583_v15, 4  ;;  %v2360_v15 = vld [vmem:[%s2661_s30 + $0x3c] sm:$0xf] }
 0x12f   : > { %v1589_v34 = vsel %vm2672_vm2, %v1584_v38, %v1588_v24  ;;  %v1471_v38 = vshrl.u32 %v2360_v15, 16  ;;  %v1474_v24 = vshll.u32 %v2360_v15, 16 }
 0x130   : > { %1339 = vrot.lane.b32.xlu1 %v2350_v48, %s2589_s10  ;;  %v1758_v48 = vsel %vm2740_vm5, %v1756_v41, %v1757_v42 }
 0x131   : > { %1337 = vrot.lane.b32.xlu0 %v2349_v1, %s2589_s10  ;;  %1331 = vrot.lane.b32.xlu2 %v2346_v55, %s2589_s10  ;;  %v1755_v1 = vsel %vm2740_vm5, %v2406_v45, %v1754_v32  ;;  %v2330_v55 = vrot.slane %v2312_v50, 9  ;;  %v1482_v32 = vrot.slane %v1480_v21, 5  ;;  %v1473_v36 = vrot.slane %v1471_v38, 4 }
 0x132   : > { %v1228_v61 = vpop.permute.xlu1 %1227  ;;  %v1476_v39 = vrot.slane %v1474_v24, 5 }
 0x133   : > { %1268 = vst.msk [vmem:[#allocation2 + $0x20] sm:$0xf] %vm1259_vm11, %v1228_v61  ;;  %v1069_v2 = vpop.permute.xlu0 %1068  ;;  %v1336_v6 = vpop.permute.xlu2 %1335 }
 0x134   : > { %1104 = vst.msk [vmem:[#allocation2 + $0x34] sm:$0xf] %vm1090_vm10, %v1069_v2 }
 0x135   : > { %1366 = vst.msk [vmem:[#allocation2 + $0x20] sm:$0xf] %vm1357_vm13, %v1326_v47  ;;  %v1178_v47 = vrot.slane %v2313_v43, 5  ;;  %v2378_v43 = vld [vmem:[%s2661_s30 + $0x24] sm:$0xe] }
 0x137   : > { %v1180_v52 = vrot.slane %v1178_v47, 4  ;;  %v1179_v2 = vsel %vm2740_vm5, %v2330_v55, %v1178_v47  ;;  %v1477_v47 = vor.u32 %v1476_v39, %v1473_v36 }
 0x138   : > { %1618 = vrot.lane.b32.xlu1 %v1579_v9, %s2590_s11  ;;  %v2356_v9 = vld [vmem:[%s2661_s30 + $0x2c] sm:$0x1] }
 0x139   : > { %1612 = vrot.lane.b32.xlu0 %v1541_v11, %s2590_s11  ;;  %1610 = vrot.lane.b32.xlu2 %v1531_v14, %s2590_s11  ;;  %v1182_v62 = vsel %vm2740_vm5, %v1180_v52, %v1181_v53  ;;  %v1428_v11 = vrot.slane %v1426_v4, 5  ;;  %v1442_v18 = vshll.u32 %v2356_v9, 16  ;;  %v2385_v52 = vld [vmem:[%s2661_s30 + $0x40] sm:$0xf]  ;;  %v1478_v55 = vrot.slane %v1477_v47, 4 }
 0x13a   : > { %v1238_v20 = vpop.permute.xlu1 %1237  ;;  %v1726_v58 = vrot.slane %v2385_v52, 5 }
 0x13b   : > { %1273 = vst.msk [vmem:[#allocation2 + $0x34] sm:$0xf] %vm1259_vm11, %v1238_v20  ;;  %v1236_v22 = vpop.permute.xlu0 %1235  ;;  %v1615_v27 = vpop.permute.xlu2 %1614  ;;  %v1429_v20 = vor.u32 %v1428_v11, %v1425_v10 }
 0x13c   : > { %1272 = vst.msk [vmem:[#allocation2 + $0x30] sm:$0xf] %vm1259_vm11, %v1236_v22  ;;  %v1484_v22 = vshrl.u32 %v2361_v13, 16  ;;  %v1728_v0 = vrot.slane %v1726_v58, 4 }
 0x13d   : > { %1371 = vst.msk [vmem:[#allocation2 + $0x34] sm:$0xf] %vm1357_vm13, %v1336_v6  ;;  %v1434_v6 = vrot.slane %v1432_v63, 5  ;;  %v1430_v31 = vrot.slane %v1429_v20, 4  ;;  %v2380_v63 = vld [vmem:[%s2661_s30 + $0x2c] sm:$0x1] }
 0x13e   : > { %v1486_v33 = vrot.slane %v1484_v22, 4 }
 0x13f   : > { %v1439_v17 = vor.u32 %v1438_v7, %v1434_v6  ;;  %v1435_v42 = vsel %vm2672_vm2, %v1430_v31, %v1434_v6  ;;  %v1715_v7 = vrot.slane %v2380_v63, 5 }
 0x140   : > { %1781 = vrot.lane.b32.xlu1 %v1744_v28, %s2591_s12  ;;  %v1444_v28 = vrot.slane %v1442_v18, 5  ;;  %v1487_v45 = vor.u32 %v1486_v33, %v1482_v32 }
 0x141   : > { %1779 = vrot.lane.b32.xlu0 %v1741_v29, %s2591_s12  ;;  %1620 = vrot.lane.b32.xlu2 %v1589_v34, %s2590_s11 }
 0x142   : > { %v1334_v40 = vpop.permute.xlu1 %1333 }
 0x143   : > { %1370 = vst.msk [vmem:[#allocation2 + $0x30] sm:$0xf] %vm1357_vm13, %v1334_v40  ;;  %v1328_v44 = vpop.permute.xlu0 %1327  ;;  %v1778_v37 = vpop.permute.xlu2 %1777 }
 0x144   : > { %1367 = vst.msk [vmem:[#allocation2 + $0x24] sm:$0xf] %vm1357_vm13, %v1328_v44  ;;  %v2379_v44 = vld [vmem:[%s2661_s30 + $0x28] sm:$0xf] }
 0x145   : > { %1651 = vst.msk [vmem:[#allocation2 + $0x30] sm:$0xf] %vm1638_vm14, %v1615_v27  ;;  %v1440_v27 = vrot.slane %v1439_v17, 4  ;;  %v1712_v49 = vrot.slane %v2379_v44, 5 }
 0x147   : > { %v1445_v41 = vsel %vm2672_vm2, %v1440_v27, %v1444_v28  ;;  %v1714_v6 = vrot.slane %v1712_v49, 4 }
 0x148   : > { %1215 = vrot.lane.b32.xlu1 %v1165_v46, %s2588_s9  ;;  %v2342_v46 = vld [vmem:[%s2661_s30 + $0x40] sm:$0xf] }
 0x149   : > { %1789 = vrot.lane.b32.xlu0 %v1758_v48, %s2591_s12  ;;  %1787 = vrot.lane.b32.xlu2 %v1755_v1, %s2591_s12  ;;  %v2400_v48 = vrot.slane %v2378_v43, 9  ;;  %v1488_v1 = vrot.slane %v1487_v45, 4  ;;  %v1716_v10 = vsel %vm2740_vm5, %v1714_v6, %v1715_v7 }
 0x14a   : > { %v1609_v54 = vpop.permute.xlu1 %1608 }
 0x14b   : > { %1648 = vst.msk [vmem:[#allocation2 + $0x24] sm:$0xf] %vm1638_vm14, %v1609_v54  ;;  %v1607_v57 = vpop.permute.xlu0 %1606  ;;  %v1212_v61 = vpop.permute.xlu2 %1211 }
 0x14c   : > { %1647 = vst.msk [vmem:[#allocation2 + $0x20] sm:$0xf] %vm1638_vm14, %v1607_v57  ;;  %v1713_v57 = vsel %vm2740_vm5, %v2400_v48, %v1712_v49 }
 0x14d   : > { %1817 = vst.msk [vmem:[#allocation2 + $0x24] sm:$0xf] %vm1807_vm15, %v1778_v37  ;;  %v1490_v37 = vshll.u32 %v2362_v35, 16 }
 0x14e   : > { %1260 = vst.msk [vmem:[#allocation2] sm:$0xf] %vm1259_vm11, %v1212_v61  ;;  %v2384_v61 = vld [vmem:[%s2661_s30 + $0x3c] sm:$0xe]  ;;  %s234_s30 = sadd.s32 %s2253_s28, %s2252_s27 }
 0x14f   : > { %v1492_v51 = vrot.slane %v1490_v37, 5  ;;  %v2402_v4 = vrot.slane %v2384_v61, 9  ;;  %s2254_s5 = sshll.u32 %s234_s30, 2 }
 0x150   : > { %1225 = vrot.lane.b32.xlu1 %v1182_v62, %s2588_s9  ;;  %v1483_v62 = vsel %vm2672_vm2, %v1478_v55, %v1482_v32  ;;  %v3375_v55 = vld [vmem:[%s3533_s2] ss:$0 sm:$0xff]  ;;  %s3387_s7 = scalar_lea.vmem %s3535_s4, %s2254_s5 }
 0x151   : > { %1223 = vrot.lane.b32.xlu0 %v1179_v2, %s2588_s9  ;;  %1217 = vrot.lane.b32.xlu2 %v1168_v5, %s2588_s9  ;;  %v1493_v59 = vsel %vm2672_vm2, %v1488_v1, %v1492_v51  ;;  %v1729_v2 = vrot.slane %v2386_v60, 5  ;;  %v1727_v9 = vsel %vm2740_vm5, %v2402_v4, %v1726_v58  ;;  %vm2048_vm2 = vcmask 60416  }
 0x152   : > { %v1776_v8 = vpop.permute.xlu1 %1775 }
 0x153   : > { %1816 = vst.msk [vmem:[#allocation2 + $0x20] sm:$0xf] %vm1807_vm15, %v1776_v8  ;;  %v1617_v12 = vpop.permute.xlu0 %1616  ;;  %v1222_v14 = vpop.permute.xlu2 %1221  ;;  %v1730_v8 = vsel %vm2740_vm5, %v1728_v0, %v1729_v2 }
 0x154   : > { %1652 = vst.msk [vmem:[#allocation2 + $0x34] sm:$0xf] %vm1638_vm14, %v1617_v12 }
 0x155   : > { %1265 = vst.msk [vmem:[#allocation2 + $0x14] sm:$0xf] %vm1259_vm11, %v1222_v14 }
 0x158   : > { %1321 = vrot.lane.b32.xlu1 %v2341_v16, %s2589_s10 }
 0x159   : > { %1315 = vrot.lane.b32.xlu0 %v2338_v19, %s2589_s10  ;;  %1313 = vrot.lane.b32.xlu2 %v2337_v23, %s2589_s10 }
 0x15a   : > { %v1786_v29 = vpop.permute.xlu1 %1785  ;;  %v2477_v30 = vld [vmem:[#allocation2 + $0x20] sm:$0xff] }
 0x15b   : > { %1821 = vst.msk [vmem:[#allocation2 + $0x34] sm:$0xf] %vm1807_vm15, %v1786_v29  ;;  %v1784_v34 = vpop.permute.xlu0 %1783  ;;  %2451 = vmatmul.msk.bf16.vlgmr.msra.gmra.mxu2 %vm1904_vm0, %v2477_v30  ;;  %v1318_v40 = vpop.permute.xlu2 %1317 }
 0x15c   : > { %1820 = vst.msk [vmem:[#allocation2 + $0x30] sm:$0xf] %vm1807_vm15, %v1784_v34 }
 0x160   : > { %1596 = vrot.lane.b32.xlu1 %v1445_v41, %s2590_s11 }
 0x161   : > { %1594 = vrot.lane.b32.xlu0 %v1435_v42, %s2590_s11  ;;  %1323 = vrot.lane.b32.xlu2 %v2342_v46, %s2589_s10 }
 0x162   : > { %v1220_v50 = vpop.permute.xlu1 %1219 }
 0x163   : > { %1264 = vst.msk [vmem:[#allocation2 + $0x10] sm:$0xf] %vm1259_vm11, %v1220_v50  ;;  %v1214_v53 = vpop.permute.xlu0 %1213  ;;  %v2479_v54 = vld [vmem:[#allocation2 + $0x30] sm:$0xff]  ;;  %v1593_v56 = vpop.permute.xlu2 %1592 }
 0x164   : > { %1261 = vst.msk [vmem:[#allocation2 + $0x4] sm:$0xf] %vm1259_vm11, %v1214_v53  ;;  %2453 = vmatmul.msk.bf16.vlgmr.msra.gmra.mxu3 %vm1904_vm0, %v2479_v54 }
 0x165   : > { %1362 = vst.msk [vmem:[#allocation2 + $0x10] sm:$0xf] %vm1357_vm13, %v1318_v40 }
 0x168   : > { %1763 = vrot.lane.b32.xlu1 %v1713_v57, %s2591_s12  ;;  %v3377_v57 = vstv %s1982_s26 }
 0x169   : > { %1604 = vrot.lane.b32.xlu0 %v1493_v59, %s2590_s11  ;;  %1602 = vrot.lane.b32.xlu2 %v1483_v62, %s2590_s11 }
 0x16a   : > { %v1312_v3 = vpop.permute.xlu1 %1311 }
 0x16b   : > { %1359 = vst.msk [vmem:[#allocation2 + $0x4] sm:$0xf] %vm1357_vm13, %v1312_v3  ;;  %v1310_v5 = vpop.permute.xlu0 %1309  ;;  %v1760_v25 = vpop.permute.xlu2 %1759 }
 0x16c   : > { %1358 = vst.msk [vmem:[#allocation2] sm:$0xf] %vm1357_vm13, %v1310_v5 }
 0x16d   : > { %1640 = vst.msk [vmem:[#allocation2 + $0x4] sm:$0xf] %vm1638_vm14, %v1593_v56 }
 0x170   : > { %1773 = vrot.lane.b32.xlu1 %v1730_v8, %s2591_s12 }
 0x171   : > { %1771 = vrot.lane.b32.xlu0 %v1727_v9, %s2591_s12  ;;  %1765 = vrot.lane.b32.xlu2 %v1716_v10, %s2591_s12 }
 0x172   : > { %v1591_v11 = vpop.permute.xlu1 %1590 }
 0x173   : > { %1639 = vst.msk [vmem:[#allocation2] sm:$0xf] %vm1638_vm14, %v1591_v11  ;;  %v1320_v12 = vpop.permute.xlu0 %1319  ;;  %v1770_v13 = vpop.permute.xlu2 %1769 }
 0x174   : > { %1363 = vst.msk [vmem:[#allocation2 + $0x14] sm:$0xf] %vm1357_vm13, %v1320_v12 }
 0x175   : > { %1808 = vst.msk [vmem:[#allocation2] sm:$0xf] %vm1807_vm15, %v1760_v25 }
 0x17a   : > { %v1601_v14 = vpop.permute.xlu1 %1600 }
 0x17b   : > { %1644 = vst.msk [vmem:[#allocation2 + $0x14] sm:$0xf] %vm1638_vm14, %v1601_v14  ;;  %v1599_v26 = vpop.permute.xlu0 %1598  ;;  %v1073_v15 = vpop.permute.xlu2 %1072 }
 0x17c   : > { %1643 = vst.msk [vmem:[#allocation2 + $0x10] sm:$0xf] %vm1638_vm14, %v1599_v26 }
 0x17d   : > { %1813 = vst.msk [vmem:[#allocation2 + $0x14] sm:$0xf] %vm1807_vm15, %v1770_v13 }
 0x17e   : > { %1106 = vst.msk [vmem:[#allocation2 + $0x3c] sm:$0xf] %vm1090_vm10, %v1073_v15 }
 0x182   : > { %v1768_v16 = vpop.permute.xlu1 %1767 }
 0x183   : > { %1812 = vst.msk [vmem:[#allocation2 + $0x10] sm:$0xf] %vm1807_vm15, %v1768_v16  ;;  %v1762_v17 = vpop.permute.xlu0 %1761  ;;  %v1240_v18 = vpop.permute.xlu2 %1239 }
 0x184   : > { %1809 = vst.msk [vmem:[#allocation2 + $0x4] sm:$0xf] %vm1807_vm15, %v1762_v17 }
 0x18a   : > { %v1071_v19 = vpop.permute.xlu1 %1070  ;;  %v2475_v20 = vld [vmem:[#allocation2 + $0x10] sm:$0xff] }
 0x18b   : > { %1105 = vst.msk [vmem:[#allocation2 + $0x38] sm:$0xf] %vm1090_vm10, %v1071_v19  ;;  %v1065_v21 = vpop.permute.xlu0 %1064  ;;  %v2473_v22 = vld [vmem:[#allocation2] sm:$0xff]  ;;  %2449 = vmatmul.msk.bf16.vlgmr.msra.gmra.mxu1 %vm1904_vm0, %v2475_v20  ;;  %v1332_v23 = vpop.permute.xlu2 %1331 }
 0x18c   : > { %1102 = vst.msk [vmem:[#allocation2 + $0x2c] sm:$0xf] %vm1090_vm10, %v1065_v21  ;;  %2447 = vmatmul.msk.bf16.vlgmr.msra.gmra.mxu0 %vm1904_vm0, %v2473_v22 }
 0x18d   : > { %1274 = vst.msk [vmem:[#allocation2 + $0x38] sm:$0xf] %vm1259_vm11, %v1240_v18 }
 0x192   : > { %v1234_v38 = vpop.permute.xlu1 %1233 }
 0x193   : > { %1271 = vst.msk [vmem:[#allocation2 + $0x2c] sm:$0xf] %vm1259_vm11, %v1234_v38  ;;  %v1232_v24 = vpop.permute.xlu0 %1231  ;;  %v1611_v27 = vpop.permute.xlu2 %1610 }
 0x194   : > { %1270 = vst.msk [vmem:[#allocation2 + $0x28] sm:$0xf] %vm1259_vm11, %v1232_v24 }
 0x195   : > { %1369 = vst.msk [vmem:[#allocation2 + $0x2c] sm:$0xf] %vm1357_vm13, %v1332_v23 }
 0x19a   : > { %v1330_v28 = vpop.permute.xlu1 %1329 }
 0x19b   : > { %1368 = vst.msk [vmem:[#allocation2 + $0x28] sm:$0xf] %vm1357_vm13, %v1330_v28  ;;  %v1242_v29 = vpop.permute.xlu0 %1241  ;;  %v1621_v30 = vpop.permute.xlu2 %1620 }
 0x19c   : > { %1275 = vst.msk [vmem:[#allocation2 + $0x3c] sm:$0xf] %vm1259_vm11, %v1242_v29 }
 0x19d   : > { %1649 = vst.msk [vmem:[#allocation2 + $0x28] sm:$0xf] %vm1638_vm14, %v1611_v27 }
 0x1a2   : > { %v1340_v31 = vpop.permute.xlu1 %1339 }
 0x1a3   : > { %1373 = vst.msk [vmem:[#allocation2 + $0x3c] sm:$0xf] %vm1357_vm13, %v1340_v31  ;;  %v1338_v32 = vpop.permute.xlu0 %1337  ;;  %v1788_v33 = vpop.permute.xlu2 %1787 }
 0x1a4   : > { %1372 = vst.msk [vmem:[#allocation2 + $0x38] sm:$0xf] %vm1357_vm13, %v1338_v32 }
 0x1a5   : > { %1654 = vst.msk [vmem:[#allocation2 + $0x3c] sm:$0xf] %vm1638_vm14, %v1621_v30 }
 0x1aa   : > { %v1619_v34 = vpop.permute.xlu1 %1618 }
 0x1ab   : > { %1653 = vst.msk [vmem:[#allocation2 + $0x38] sm:$0xf] %vm1638_vm14, %v1619_v34  ;;  %v1613_v35 = vpop.permute.xlu0 %1612  ;;  %v1218_v36 = vpop.permute.xlu2 %1217 }
 0x1ac   : > { %1650 = vst.msk [vmem:[#allocation2 + $0x2c] sm:$0xf] %vm1638_vm14, %v1613_v35 }
 0x1ad   : > { %1822 = vst.msk [vmem:[#allocation2 + $0x38] sm:$0xf] %vm1807_vm15, %v1788_v33 }
 0x1ae   : > { %1263 = vst.msk [vmem:[#allocation2 + $0xc] sm:$0xf] %vm1259_vm11, %v1218_v36 }
 0x1b2   : > { %v1782_v39 = vpop.permute.xlu1 %1781 }
 0x1b3   : > { %1819 = vst.msk [vmem:[#allocation2 + $0x2c] sm:$0xf] %vm1807_vm15, %v1782_v39  ;;  %v1780_v40 = vpop.permute.xlu0 %1779  ;;  %v1314_v41 = vpop.permute.xlu2 %1313 }
 0x1b4   : > { %1818 = vst.msk [vmem:[#allocation2 + $0x28] sm:$0xf] %vm1807_vm15, %v1780_v40 }
 0x1ba   : > { %v1216_v42 = vpop.permute.xlu1 %1215 }
 0x1bb   : > { %1262 = vst.msk [vmem:[#allocation2 + $0x8] sm:$0xf] %vm1259_vm11, %v1216_v42  ;;  %v1790_v43 = vpop.permute.xlu0 %1789  ;;  %v2478_v44 = vld [vmem:[#allocation2 + $0x28] sm:$0xff]  ;;  %v1324_v45 = vpop.permute.xlu2 %1323 }
 0x1bc   : > { %1823 = vst.msk [vmem:[#allocation2 + $0x3c] sm:$0xf] %vm1807_vm15, %v1790_v43  ;;  %2452 = vmatmul.msk.bf16.gmra.mxu2 %vm1904_vm0, %v2478_v44 }
 0x1bd   : > { %1360 = vst.msk [vmem:[#allocation2 + $0x8] sm:$0xf] %vm1357_vm13, %v1314_v41 }
 0x1c2   : > { %v1226_v37 = vpop.permute.xlu1 %1225 }
 0x1c3   : > { %1267 = vst.msk [vmem:[#allocation2 + $0x1c] sm:$0xf] %vm1259_vm11, %v1226_v37  ;;  %v1224_v46 = vpop.permute.xlu0 %1223  ;;  %v2480_v47 = vld [vmem:[#allocation2 + $0x38] sm:$0xff]  ;;  %v1603_v48 = vpop.permute.xlu2 %1602 }
 0x1c4   : > { %1266 = vst.msk [vmem:[#allocation2 + $0x18] sm:$0xf] %vm1259_vm11, %v1224_v46  ;;  %2454 = vmatmul.msk.bf16.gmra.mxu3 %vm1904_vm0, %v2480_v47 }
 0x1c5   : > { %1365 = vst.msk [vmem:[#allocation2 + $0x1c] sm:$0xf] %vm1357_vm13, %v1324_v45 }
 0x1ca   : > { %v1322_v49 = vpop.permute.xlu1 %1321 }
 0x1cb   : > { %1364 = vst.msk [vmem:[#allocation2 + $0x18] sm:$0xf] %vm1357_vm13, %v1322_v49  ;;  %v1316_v50 = vpop.permute.xlu0 %1315  ;;  %v1766_v51 = vpop.permute.xlu2 %1765 }
 0x1cc   : > { %1361 = vst.msk [vmem:[#allocation2 + $0xc] sm:$0xf] %vm1357_vm13, %v1316_v50 }
 0x1cd   : > { %1645 = vst.msk [vmem:[#allocation2 + $0x18] sm:$0xf] %vm1638_vm14, %v1603_v48 }
 0x1d2   : > { %v1597_v1 = vpop.permute.xlu1 %1596 }
 0x1d3   : > { %1642 = vst.msk [vmem:[#allocation2 + $0xc] sm:$0xf] %vm1638_vm14, %v1597_v1  ;;  %v1595_v52 = vpop.permute.xlu0 %1594 }
 0x1d4   : > { %1641 = vst.msk [vmem:[#allocation2 + $0x8] sm:$0xf] %vm1638_vm14, %v1595_v52 }
 0x1d5   : > { %1811 = vst.msk [vmem:[#allocation2 + $0xc] sm:$0xf] %vm1807_vm15, %v1766_v51 }
 0x1da   : > { %v1764_v53 = vpop.permute.xlu1 %1763 }
 0x1db   : > { %1810 = vst.msk [vmem:[#allocation2 + $0x8] sm:$0xf] %vm1807_vm15, %v1764_v53  ;;  %v1605_v54 = vpop.permute.xlu0 %1604 }
 0x1dc   : > { %1646 = vst.msk [vmem:[#allocation2 + $0x1c] sm:$0xf] %vm1638_vm14, %v1605_v54 }
 0x1de   : > { %v1962_v56 = vpop.f32.mrf.mxu2 }
 0x1df   : > { %v1963_v58 = vadd.f32 %v3375_v55, %v1962_v56 }
 0x1e1   : > { %vm1991_vm1 = vcmp.gt.f32.partialorder %v1963_v58, 0.0  ;;  %v2008_v59 = vmul.f32 %v3377_v57, %v1963_v58 }
 0x1e2   : > { %v1774_v60 = vpop.permute.xlu1 %1773  ;;  %v2474_v61 = vld [vmem:[#allocation2 + $0x8] sm:$0xff] }
 0x1e3   : > { %1815 = vst.msk [vmem:[#allocation2 + $0x1c] sm:$0xf] %vm1807_vm15, %v1774_v60  ;;  %v1772_v62 = vpop.permute.xlu0 %1771  ;;  %2448 = vmatmul.msk.bf16.gmra.mxu0 %vm1904_vm0, %v2474_v61  ;;  %v2024_v63 = vsel %vm1991_vm1, %v1963_v58, %v2008_v59 }
 0x1e4   : > { %1814 = vst.msk [vmem:[#allocation2 + $0x18] sm:$0xf] %vm1807_vm15, %v1772_v62  ;;  %v3389_v0 = vpack.c.bf16 %v2024_v63, %v2024_v63 }
 0x1e6   : > { %v1964_v2 = vpop.f32.mrf.mxu2  ;;  %2057 = vst.msk [vmem:[%s3387_s7 + $0x40] sm:$0xf] %vm2048_vm2, %v3389_v0 }
 0x1e7   : > { %v1965_v3 = vadd.f32 %v3375_v55, %v1964_v2  ;;  %v1972_v4 = vpop.f32.mrf.mxu3 }
 0x1e8   : > { %v1973_v5 = vadd.f32 %v3375_v55, %v1972_v4 }
 0x1e9   : > { %vm1992_vm3 = vcmp.gt.f32.partialorder %v1965_v3, 0.0  ;;  %v2009_v6 = vmul.f32 %v3377_v57, %v1965_v3 }
 0x1ea   : > { %vm1995_vm4 = vcmp.gt.f32.partialorder %v1973_v5, 0.0  ;;  %v2012_v7 = vmul.f32 %v3377_v57, %v1973_v5 }
 0x1eb   : > { %v2476_v25 = vld [vmem:[#allocation2 + $0x18] sm:$0xff]  ;;  %v2025_v8 = vsel %vm1992_vm3, %v1965_v3, %v2009_v6 }
 0x1ec   : > { %2450 = vmatmul.msk.bf16.gmra.mxu1 %vm1904_vm0, %v2476_v25  ;;  %v3399_v9 = vpack.c.bf16 %v2025_v8, %v2025_v8  ;;  %v2028_v10 = vsel %vm1995_vm4, %v1973_v5, %v2012_v7 }
 0x1ed   : > { %v3401_v11 = vpack.c.bf16 %v2028_v10, %v2028_v10 }
 0x1ee   : > { %2058 = vst.msk [vmem:[%s3387_s7 + $0x44] sm:$0xf] %vm2048_vm2, %v3399_v9 }
 0x1ef   : > { %v1974_v12 = vpop.f32.mrf.mxu3  ;;  %2061 = vst.msk [vmem:[%s3387_s7 + $0x60] sm:$0xf] %vm2048_vm2, %v3401_v11 }
 0x1f0   : > { %v1975_v13 = vadd.f32 %v3375_v55, %v1974_v12 }
 0x1f2   : > { %vm1996_vm5 = vcmp.gt.f32.partialorder %v1975_v13, 0.0  ;;  %v2013_v14 = vmul.f32 %v3377_v57, %v1975_v13 }
 0x1f4   : > { %v2029_v26 = vsel %vm1996_vm5, %v1975_v13, %v2013_v14 }
 0x1f5   : > { %v3411_v15 = vpack.c.bf16 %v2029_v26, %v2029_v26 }
 0x1f7   : > { %2062 = vst.msk [vmem:[%s3387_s7 + $0x64] sm:$0xf] %vm2048_vm2, %v3411_v15 }
 0x208   : > { %v1952_v16 = vpop.f32.mrf.mxu1 }
 0x209   : > { %v1942_v17 = vpop.f32.mrf.mxu0  ;;  %v1953_v18 = vadd.f32 %v3375_v55, %v1952_v16 }
 0x20a   : > { %v1943_v19 = vadd.f32 %v3375_v55, %v1942_v17 }
 0x20b   : > { %vm1987_vm6 = vcmp.gt.f32.partialorder %v1953_v18, 0.0  ;;  %v2004_v20 = vmul.f32 %v3377_v57, %v1953_v18 }
 0x20c   : > { %vm1983_vm7 = vcmp.gt.f32.partialorder %v1943_v19, 0.0  ;;  %v2000_v21 = vmul.f32 %v3377_v57, %v1943_v19 }
 0x20d   : > { %v2020_v22 = vsel %vm1987_vm6, %v1953_v18, %v2004_v20 }
 0x20e   : > { %v2016_v23 = vsel %vm1983_vm7, %v1943_v19, %v2000_v21  ;;  %v2036_v38 = vpack.c.bf16 %v2020_v22, %v2020_v22 }
 0x20f   : > { %v2032_v24 = vpack.c.bf16 %v2016_v23, %v2016_v23 }
 0x210   : > { %v1954_v27 = vpop.f32.mrf.mxu1  ;;  %2053 = vst.msk [vmem:[%s3387_s7 + $0x20] sm:$0xf] %vm2048_vm2, %v2036_v38 }
 0x211   : > { %v1944_v28 = vpop.f32.mrf.mxu0  ;;  %v1955_v29 = vadd.f32 %v3375_v55, %v1954_v27  ;;  %2081 = vrot.lane.b32.xlu2 %v2032_v24, %s2592_s8  ;;  %2049 = vst.msk [vmem:[%s3387_s7] sm:$0xf] %vm2048_vm2, %v2032_v24 }
 0x212   : > { %v1945_v30 = vadd.f32 %v3375_v55, %v1944_v28 }
 0x213   : > { %vm1988_vm8 = vcmp.gt.f32.partialorder %v1955_v29, 0.0  ;;  %v2005_v31 = vmul.f32 %v3377_v57, %v1955_v29 }
 0x214   : > { %vm1984_vm9 = vcmp.gt.f32.partialorder %v1945_v30, 0.0  ;;  %v2001_v32 = vmul.f32 %v3377_v57, %v1945_v30 }
 0x215   : > { %v2021_v33 = vsel %vm1988_vm8, %v1955_v29, %v2005_v31 }
 0x216   : > { %v2017_v34 = vsel %vm1984_vm9, %v1945_v30, %v2001_v32  ;;  %v2037_v35 = vpack.c.bf16 %v2021_v33, %v2021_v33 }
 0x217   : > { %v2033_v36 = vpack.c.bf16 %v2017_v34, %v2017_v34 }
 0x218   : > { %2054 = vst.msk [vmem:[%s3387_s7 + $0x24] sm:$0xf] %vm2048_vm2, %v2037_v35 }
 0x219   : > { %2083 = vrot.lane.b32.xlu0 %v2033_v36, %s2592_s8  ;;  %2050 = vst.msk [vmem:[%s3387_s7 + $0x4] sm:$0xf] %vm2048_vm2, %v2033_v36 }
 0x221   : > { %2089 = vrot.lane.b32.xlu0 %v2036_v38, %s2592_s8 }
 0x23f   : > { %v1967_v39 = vpop.f32.mrf.mxu2 }
 0x240   : > { %v1968_v40 = vadd.f32 %v3375_v55, %v1967_v39 }
 0x242   : > { %vm1993_vm10 = vcmp.gt.f32.partialorder %v1968_v40, 0.0  ;;  %v2010_v41 = vmul.f32 %v3377_v57, %v1968_v40 }
 0x244   : > { %v2026_v42 = vsel %vm1993_vm10, %v1968_v40, %v2010_v41 }
 0x245   : > { %v2042_v43 = vpack.c.bf16 %v2026_v42, %v2026_v42 }
 0x247   : > { %v1969_v44 = vpop.f32.mrf.mxu2  ;;  %v1977_v45 = vpop.f32.mrf.mxu3  ;;  %2059 = vst.msk [vmem:[%s3387_s7 + $0x50] sm:$0xf] %vm2048_vm2, %v2042_v43 }
 0x248   : > { %v1970_v37 = vadd.f32 %v3375_v55, %v1969_v44  ;;  %v1978_v46 = vadd.f32 %v3375_v55, %v1977_v45 }
 0x24a   : > { %vm1994_vm11 = vcmp.gt.f32.partialorder %v1970_v37, 0.0  ;;  %v2011_v47 = vmul.f32 %v3377_v57, %v1970_v37  ;;  %vm1997_vm12 = vcmp.gt.f32.partialorder %v1978_v46, 0.0  ;;  %v2014_v48 = vmul.f32 %v3377_v57, %v1978_v46 }
 0x24c   : > { %v2027_v49 = vsel %vm1994_vm11, %v1970_v37, %v2011_v47  ;;  %v2030_v50 = vsel %vm1997_vm12, %v1978_v46, %v2014_v48 }
 0x24d   : > { %v2043_v1 = vpack.c.bf16 %v2027_v49, %v2027_v49  ;;  %v2046_v51 = vpack.c.bf16 %v2030_v50, %v2030_v50 }
 0x24f   : > { %v1979_v52 = vpop.f32.mrf.mxu3  ;;  %2060 = vst.msk [vmem:[%s3387_s7 + $0x54] sm:$0xf] %vm2048_vm2, %v2043_v1 }
 0x250   : > { %v1980_v53 = vadd.f32 %v3375_v55, %v1979_v52  ;;  %2063 = vst.msk [vmem:[%s3387_s7 + $0x70] sm:$0xf] %vm2048_vm2, %v2046_v51 }
 0x252   : > { %vm1998_vm13 = vcmp.gt.f32.partialorder %v1980_v53, 0.0  ;;  %v2015_v54 = vmul.f32 %v3377_v57, %v1980_v53 }
 0x254   : > { %v2031_v56 = vsel %vm1998_vm13, %v1980_v53, %v2015_v54 }
 0x255   : > { %v2047_v58 = vpack.c.bf16 %v2031_v56, %v2031_v56 }
 0x257   : > { %2064 = vst.msk [vmem:[%s3387_s7 + $0x74] sm:$0xf] %vm2048_vm2, %v2047_v58 }
 0x260   : > { %v1947_v59 = vpop.f32.mrf.mxu0 }
 0x261   : > { %v1948_v60 = vadd.f32 %v3375_v55, %v1947_v59 }
 0x263   : > { %vm1985_vm14 = vcmp.gt.f32.partialorder %v1948_v60, 0.0  ;;  %v2002_v61 = vmul.f32 %v3377_v57, %v1948_v60 }
 0x265   : > { %v2018_v62 = vsel %vm1985_vm14, %v1948_v60, %v2002_v61 }
 0x266   : > { %v2034_v63 = vpack.c.bf16 %v2018_v62, %v2018_v62 }
 0x268   : > { %v1949_v2 = vpop.f32.mrf.mxu0  ;;  %2085 = vrot.lane.b32.xlu1 %v2034_v63, %s2592_s8  ;;  %2051 = vst.msk [vmem:[%s3387_s7 + $0x10] sm:$0xf] %vm2048_vm2, %v2034_v63 }
 0x269   : > { %v1950_v3 = vadd.f32 %v3375_v55, %v1949_v2  ;;  %v1957_v4 = vpop.f32.mrf.mxu1 }
 0x26a   : > { %v1958_v5 = vadd.f32 %v3375_v55, %v1957_v4 }
 0x26b   : > { %vm1986_vm15 = vcmp.gt.f32.partialorder %v1950_v3, 0.0  ;;  %v2003_v6 = vmul.f32 %v3377_v57, %v1950_v3  ;;  %v2082_v7 = vpop.permute.xlu2 %2081 }
 0x26c   : > { %vm1989_vm0 = vcmp.gt.f32.partialorder %v1958_v5, 0.0  ;;  %v2006_v25 = vmul.f32 %v3377_v57, %v1958_v5  ;;  %2455 = vst.msk [vmem:[%s3387_s7 + $0x8] sm:$0xf] %vm2048_vm2, %v2082_v7 }
 0x26d   : > { %v2019_v8 = vsel %vm1986_vm15, %v1950_v3, %v2003_v6 }
 0x26e   : > { %v2035_v10 = vpack.c.bf16 %v2019_v8, %v2019_v8  ;;  %v2022_v12 = vsel %vm1989_vm0, %v1958_v5, %v2006_v25 }
 0x26f   : > { %v2038_v13 = vpack.c.bf16 %v2022_v12, %v2022_v12 }
 0x270   : > { %2091 = vrot.lane.b32.xlu1 %v2037_v35, %s2592_s8  ;;  %2052 = vst.msk [vmem:[%s3387_s7 + $0x14] sm:$0xf] %vm2048_vm2, %v2035_v10  ;;  %2087 = vrot.lane.b32.xlu2 %v2035_v10, %s2592_s8 }
 0x271   : > { %v1959_v14 = vpop.f32.mrf.mxu1  ;;  %2055 = vst.msk [vmem:[%s3387_s7 + $0x30] sm:$0xf] %vm2048_vm2, %v2038_v13 }
 0x272   : > { %v1960_v26 = vadd.f32 %v3375_v55, %v1959_v14 }
 0x274   : > { %vm1990_vm1 = vcmp.gt.f32.partialorder %v1960_v26, 0.0  ;;  %v2007_v16 = vmul.f32 %v3377_v57, %v1960_v26 }
 0x276   : > { %v2023_v17 = vsel %vm1990_vm1, %v1960_v26, %v2007_v16 }
 0x277   : > { %v2039_v18 = vpack.c.bf16 %v2023_v17, %v2023_v17 }
 0x278   : > { %2097 = vrot.lane.b32.xlu1 %v3389_v0, %s2592_s8  ;;  %2093 = vrot.lane.b32.xlu2 %v2038_v13, %s2592_s8 }
 0x279   : > { %2056 = vst.msk [vmem:[%s3387_s7 + $0x34] sm:$0xf] %vm2048_vm2, %v2039_v18  ;;  %2095 = vrot.lane.b32.xlu0 %v2039_v18, %s2592_s8 }
 0x280   : > { %2103 = vrot.lane.b32.xlu1 %v2043_v1, %s2592_s8  ;;  %2099 = vrot.lane.b32.xlu2 %v3399_v9, %s2592_s8 }
 0x281   : > { %2101 = vrot.lane.b32.xlu0 %v2042_v43, %s2592_s8 }
 0x288   : > { %2109 = vrot.lane.b32.xlu1 %v2046_v51, %s2592_s8  ;;  %2105 = vrot.lane.b32.xlu2 %v3401_v11, %s2592_s8 }
 0x289   : > { %2107 = vrot.lane.b32.xlu0 %v3411_v15, %s2592_s8 }
 0x28b   : > { %v2084_v55 = vpop.permute.xlu0 %2083 }
 0x28c   : > { %2456 = vst.msk [vmem:[%s3387_s7 + $0xc] sm:$0xf] %vm2048_vm2, %v2084_v55 }
 0x290   : > { %2111 = vrot.lane.b32.xlu2 %v2047_v58, %s2592_s8 }
 0x293   : > { %v2090_v57 = vpop.permute.xlu0 %2089 }
 0x294   : > { %2459 = vst.msk [vmem:[%s3387_s7 + $0x28] sm:$0xf] %vm2048_vm2, %v2090_v57 }
 0x2ca   : > { %v2088_v0 = vpop.permute.xlu2 %2087 }
 0x2cb   : > { %2458 = vst.msk [vmem:[%s3387_s7 + $0x1c] sm:$0xf] %vm2048_vm2, %v2088_v0 }
 0x2d2   : > { %v2094_v9 = vpop.permute.xlu2 %2093 }
 0x2d3   : > { %2461 = vst.msk [vmem:[%s3387_s7 + $0x38] sm:$0xf] %vm2048_vm2, %v2094_v9 }
 0x2da   : > { %v2086_v11 = vpop.permute.xlu1 %2085  ;;  %v2100_v15 = vpop.permute.xlu2 %2099 }
 0x2db   : > { %2457 = vst.msk [vmem:[%s3387_s7 + $0x18] sm:$0xf] %vm2048_vm2, %v2086_v11 }
 0x2dc   : > { %2464 = vst.msk [vmem:[%s3387_s7 + $0x4c] sm:$0xf] %vm2048_vm2, %v2100_v15 }
 0x2e2   : > { %v2092_v19 = vpop.permute.xlu1 %2091  ;;  %v2106_v20 = vpop.permute.xlu2 %2105 }
 0x2e3   : > { %2460 = vst.msk [vmem:[%s3387_s7 + $0x2c] sm:$0xf] %vm2048_vm2, %v2092_v19 }
 0x2e4   : > { %2467 = vst.msk [vmem:[%s3387_s7 + $0x68] sm:$0xf] %vm2048_vm2, %v2106_v20 }
 0x2ea   : > { %v2098_v21 = vpop.permute.xlu1 %2097  ;;  %v2112_v22 = vpop.permute.xlu2 %2111 }
 0x2eb   : > { %2463 = vst.msk [vmem:[%s3387_s7 + $0x48] sm:$0xf] %vm2048_vm2, %v2098_v21  ;;  %v2096_v23 = vpop.permute.xlu0 %2095 }
 0x2ec   : > { %2462 = vst.msk [vmem:[%s3387_s7 + $0x3c] sm:$0xf] %vm2048_vm2, %v2096_v23 }
 0x2ed   : > { %2470 = vst.msk [vmem:[%s3387_s7 + $0x7c] sm:$0xf] %vm2048_vm2, %v2112_v22 }
 0x2f2   : > { %v2104_v38 = vpop.permute.xlu1 %2103 }
 0x2f3   : > { %2466 = vst.msk [vmem:[%s3387_s7 + $0x5c] sm:$0xf] %vm2048_vm2, %v2104_v38  ;;  %v2102_v24 = vpop.permute.xlu0 %2101 }
 0x2f4   : > { %2465 = vst.msk [vmem:[%s3387_s7 + $0x58] sm:$0xf] %vm2048_vm2, %v2102_v24 }
 0x2fa   : > { %v2110_v27 = vpop.permute.xlu1 %2109 }
 0x2fb   : > { %2469 = vst.msk [vmem:[%s3387_s7 + $0x78] sm:$0xf] %vm2048_vm2, %v2110_v27  ;;  %v2108_v28 = vpop.permute.xlu0 %2107 }
 0x2fc   : > { %2468 = vst.msk [vmem:[%s3387_s7 + $0x6c] sm:$0xf] %vm2048_vm2, %v2108_v28 }
 0x2fd PF: > { %s15_s21 = sadd.s32 1, %s2582_s21   ;;  %s3540_s17 = smov %s2574_s19 }
 0x2fe   : > { %p12_p8 = scmp.ge.s32.totalorder %s15_s21, 6   ;;  %s3541_s18 = smov %s2578_s20 }
 0x2ff   : > { %s3542_s19 = smov %s3545_s3  ;;  %s3543_s20 = smov %s3549_s22 }
 0x300   :  { %14 = sbr.rel (!%p12_p8) target bundleno = 3 (0x3), region = 69 }

</bundles_post_ra>
